<compile_context>
chip_gen: v5e
topology: v5e:2x2
jax: 0.10.0
libtpu: 0.0.40
codegen_flags: <defaults>
</compile_context>

<pallas_src>
import jax
import jax.numpy as jnp
from jax.experimental import pallas as pl
from jax.experimental.pallas import tpu as pltpu


# ----------------------------------------------------------------------------
# Helpers
# ----------------------------------------------------------------------------
def _round_up(x, m):
    return ((x + m - 1) // m) * m


def _pad_to(a, shape):
    return jnp.pad(a, [(0, s - d) for d, s in zip(a.shape, shape)])


def _vmem_capacity_bytes():
    try:
        info = pltpu.get_tpu_info()
        cap = getattr(info, "vmem_capacity_bytes", None)
        if cap:
            return int(cap)
    except Exception:
        pass
    return 64 * 1024 * 1024  # conservative fallback (v7x physical VMEM)


# ----------------------------------------------------------------------------
# Kernel
# ----------------------------------------------------------------------------
def _make_kernel(n_layers, tm, adj_resident):
    """Grid = (n_layers, num_row_tiles), both axes sequential ("arbitrary").

    x_hbm   : (N_pad, F_in_pad)  f32, HBM (pl.ANY)  -- DMA'd once at step 0
    adj_ref : resident (N_pad, N_pad) or streamed (tm, N_pad), compute dtype
    w0_ref  : (F_in_pad, F_hid)  f32, resident
    wh_ref  : (n_layers-1, F_hid, F_hid) f32, resident (W_1..W_{L-1})
    b_ref   : (n_layers, 1, F_hid) f32, resident
    o_ref   : (N_pad, F_hid) f32, resident output (written on last layer only)
    x_vmem  : (N_pad, F_in_pad) f32 scratch (X staging, used once)
    xw_a/b  : (N_pad, F_hid) compute-dtype scratch (ping-pong XW buffers)
    x_sem   : DMA semaphore for the one-shot X copy
    """

    def kernel(x_hbm, adj_ref, w0_ref, wh_ref, b_ref, o_ref,
               x_vmem, xw_a, xw_b, x_sem):
        l = pl.program_id(0)        # layer index
        i = pl.program_id(1)        # row-tile index
        row0 = pl.multiple_of(i * tm, tm)

        # ---- Layer-0 bootstrap: one DMA of X, then XW_0 = X @ W_0 -----------
        @pl.when(jnp.logical_and(l == 0, i == 0))
        def _():
            cp = pltpu.make_async_copy(x_hbm, x_vmem, x_sem)
            cp.start()
            cp.wait()
            xw0 = jnp.dot(x_vmem[...], w0_ref[...],
                          preferred_element_type=jnp.float32)
            xw_a[...] = xw0.astype(xw_a.dtype)

        # ---- One row tile of one layer --------------------------------------
        def layer_step(xw_in, xw_out):
            if adj_resident:
                a_rows = adj_ref[pl.ds(row0, tm), :]     # slice resident block
            else:
                a_rows = adj_ref[...]                    # streamed stripe

            agg = jnp.dot(a_rows, xw_in[...],
                          preferred_element_type=jnp.float32)
            act = agg + b_ref[l]
            act = jnp.where(act >= 0, act, 0.25 * act)   # leaky_relu(0.25)

            # Spread the NEXT layer's XW over row tiles (no per-layer bubble).
            @pl.when(l < n_layers - 1)
            def _():
                nxt = jnp.dot(act, wh_ref[l],
                              preferred_element_type=jnp.float32)
                xw_out[pl.ds(row0, tm), :] = nxt.astype(xw_out.dtype)

            # Last layer: write rows of the resident output block.
            @pl.when(l == n_layers - 1)
            def _():
                o_ref[pl.ds(row0, tm), :] = act.astype(o_ref.dtype)

        # Ping-pong the XW buffers by layer parity (static branches).
        @pl.when(l % 2 == 0)
        def _():
            layer_step(xw_a, xw_b)

        @pl.when(l % 2 == 1)
        def _():
            layer_step(xw_b, xw_a)

    return kernel


# ----------------------------------------------------------------------------
# Wrapper
# ----------------------------------------------------------------------------
def mogonet_gcn_forward(x, adj, params, dropout=0.5,
                        compute_dtype=jnp.bfloat16, row_tile=512):
    """Fused MOGONET GCN forward.

    x      : [N, in_channels] float32 node features
    adj    : [N, N]           dense (row-normalized) adjacency
    params : list of (W, b), W:[F_in, F_out], b:[F_out]  (3 layers in MOGONET)
    """
    del dropout  # TODO(synk): training-mode dropout not implemented (identity)

    n, f_in = x.shape
    n_layers = len(params)
    assert n_layers >= 2
    out_dims = [w.shape[1] for (w, _) in params]
    f_out = out_dims[-1]

    # Lane-dense feature widths.
    f_in_pad = _round_up(max(f_in, 128), 128)
    f_hid = _round_up(max(out_dims + [128]), 128)

    itemsize = jnp.dtype(compute_dtype).itemsize

    # Generation-aware VMEM budget.
    cap = _vmem_capacity_bytes()
    vmem_limit = int(cap * 0.85)          # ~108 MiB v5e/v6e, ~54 MiB v7x
    budget = int(vmem_limit * 0.85)       # headroom for compiler temporaries

    # Conservative fixed VMEM cost (assume 2 pipeline buffers for the resident
    # constant-index blocks).
    def fixed_cost(n_pad):
        return (n_pad * f_in_pad * 4                       # X staging scratch
                + 2 * n_pad * f_hid * itemsize             # XW ping/pong
                + 2 * n_pad * f_hid * 4                    # resident output
                + 2 * f_in_pad * f_hid * 4                 # W0
                + 2 * (n_layers - 1) * f_hid * f_hid * 4   # W1..Wk
                + 2 * n_layers * 8 * f_hid * 4)            # biases (padded)

    # Row tiling (n_pad is a multiple of both 128 and tm).
    n_pad0 = _round_up(n, 128)
    cands = [c for c in (512, 256, 128) if c <= min(row_tile, n_pad0)] or [128]

    tm_big = cands[0]
    n_pad_big = _round_up(n_pad0, tm_big)
    if fixed_cost(n_pad_big) + 2 * n_pad_big * n_pad_big * itemsize <= budget:
        # Fully VMEM-resident adjacency: one HBM read for all layers.
        tm, n_pad, adj_resident = tm_big, n_pad_big, True
    else:
        adj_resident = False
        tm, n_pad = cands[-1], _round_up(n_pad0, cands[-1])
        for c in cands:
            np_c = _round_up(n_pad0, c)
            if fixed_cost(np_c) + 2 * c * np_c * itemsize <= budget:
                tm, n_pad = c, np_c
                break
    num_tiles = n_pad // tm

    # Zero-padding keeps the math exact: padded feature columns / bias entries
    # are zero (so they stay zero through leaky_relu), and padded node rows
    # have zero adjacency columns so they never contaminate real rows.
    x_p = _pad_to(x.astype(jnp.float32), (n_pad, f_in_pad))
    adj_p = _pad_to(adj.astype(jnp.float32), (n_pad, n_pad)).astype(compute_dtype)
    w0_p = _pad_to(params[0][0].astype(jnp.float32), (f_in_pad, f_hid))
    wh_p = jnp.stack([_pad_to(w.astype(jnp.float32), (f_hid, f_hid))
                      for (w, _) in params[1:]])
    b_p = jnp.stack([_pad_to(b.reshape(1, -1).astype(jnp.float32), (1, f_hid))
                     for (_, b) in params])

    if adj_resident:
        adj_spec = pl.BlockSpec((n_pad, n_pad), lambda l, i: (0, 0))
    else:
        adj_spec = pl.BlockSpec((tm, n_pad), lambda l, i: (i, 0))

    kernel = _make_kernel(n_layers, tm, adj_resident)

    out = pl.pallas_call(
        kernel,
        out_shape=jax.ShapeDtypeStruct((n_pad, f_hid), jnp.float32),
        grid_spec=pltpu.PrefetchScalarGridSpec(
            num_scalar_prefetch=0,
            grid=(n_layers, num_tiles),
            in_specs=[
                pl.BlockSpec(memory_space=pl.ANY),                    # x (HBM)
                adj_spec,                                             # adjacency
                pl.BlockSpec((f_in_pad, f_hid), lambda l, i: (0, 0)),  # W0
                pl.BlockSpec((n_layers - 1, f_hid, f_hid),
                             lambda l, i: (0, 0, 0)),                 # W1..Wk
                pl.BlockSpec((n_layers, 1, f_hid),
                             lambda l, i: (0, 0, 0)),                 # biases
            ],
            # Resident output block: written only by the last layer, flushed to
            # HBM exactly once at the end of the grid.
            out_specs=pl.BlockSpec((n_pad, f_hid), lambda l, i: (0, 0)),
            scratch_shapes=[
                pltpu.VMEM((n_pad, f_in_pad), jnp.float32),   # X staging
                pltpu.VMEM((n_pad, f_hid), compute_dtype),    # XW ping
                pltpu.VMEM((n_pad, f_hid), compute_dtype),    # XW pong
                pltpu.SemaphoreType.DMA,                      # X copy sem
            ]),
        compiler_params=pltpu.CompilerParams(
            # Layer l+1 depends on every row tile of layer l through the
            # VMEM-resident XW buffers -> both axes must stay sequential.
            dimension_semantics=("arbitrary", "arbitrary"),
            vmem_limit_bytes=vmem_limit),
    )(x_p, adj_p, w0_p, wh_p, b_p)

    return out[:n, :f_out]


# ----------------------------------------------------------------------------
# Parameter init (matches MogonetGCNConv.reset_parameters)
# ----------------------------------------------------------------------------
def xavier_normal(key, fan_in, fan_out):
    std = (2.0 / (fan_in + fan_out)) ** 0.5
    return std * jax.random.normal(key, (fan_in, fan_out), dtype=jnp.float32)


def init_mogonet_gcn_params(key, in_channels, hidden_channels):
    dims = [in_channels] + list(hidden_channels)
    params = []
    for i in range(len(hidden_channels)):
        key, sub = jax.random.split(key)
        w = xavier_normal(sub, dims[i], dims[i + 1])
        b = jnp.zeros((dims[i + 1],), dtype=jnp.float32)
        params.append((w, b))
    return params


# ----------------------------------------------------------------------------
# Pure-JAX reference
# ----------------------------------------------------------------------------
def mogonet_gcn_reference(x, adj, params):
    h = x
    for (w, b) in params:
        hw = jnp.dot(h, w, precision=jax.lax.Precision.HIGHEST)
        out = jnp.dot(adj, hw, precision=jax.lax.Precision.HIGHEST) + b[None, :]
        h = jnp.where(out >= 0, out, 0.25 * out)
    return h


if __name__ == "__main__":
    key = jax.random.PRNGKey(0)

    # Small synthetic graph.
    n_nodes = 16
    in_channels = 32
    hidden_channels = [32, 32, 16]

    k_x, k_a, k_p = jax.random.split(key, 3)

    # Node features.
    x = jax.random.normal(k_x, (n_nodes, in_channels), dtype=jnp.float32)

    # Deterministic dense adjacency with self-loops, row-normalized.
    raw = jax.random.uniform(k_a, (n_nodes, n_nodes), dtype=jnp.float32)
    mask = (raw > 0.7).astype(jnp.float32)
    adj = jnp.maximum(mask, mask.T) + jnp.eye(n_nodes, dtype=jnp.float32)
    adj = adj / jnp.sum(adj, axis=1, keepdims=True)

    params = init_mogonet_gcn_params(k_p, in_channels, hidden_channels)

    ref = jax.block_until_ready(mogonet_gcn_reference(x, adj, params))

    # Default path: bf16 adjacency / XW stream, f32 MXU accumulation.
    out = jax.block_until_ready(mogonet_gcn_forward(x, adj, params))
    assert out.shape == (n_nodes, hidden_channels[-1])
    assert out.dtype == jnp.float32
    # bf16 operands (f32 accumulation) over 3 layers: N-aware tolerance.
    assert jnp.allclose(out, ref, rtol=5e-2, atol=5e-2)

    # Strict f32 parity mode.
    out_f32 = jax.block_until_ready(
        mogonet_gcn_forward(x, adj, params, compute_dtype=jnp.float32))
    assert jnp.allclose(out_f32, ref, rtol=1e-2, atol=1e-2)

    print("KERNEL_OK")
</pallas_src>

<mosaic_0001>
module attributes {stable_mosaic.version = 11 : i64} {
  func.func @kernel(%arg0: i32, %arg1: i32, %arg2: memref<128x128xf32, #tpu.memory_space<any>>, %arg3: memref<128x128xbf16, #tpu.memory_space<vmem>>, %arg4: memref<128x128xf32, #tpu.memory_space<vmem>>, %arg5: memref<2x128x128xf32, #tpu.memory_space<vmem>>, %arg6: memref<3x1x128xf32, #tpu.memory_space<vmem>>, %arg7: memref<128x128xf32, #tpu.memory_space<vmem>>, %arg8: memref<128x128xf32, #tpu.memory_space<vmem>>, %arg9: memref<128x128xbf16, #tpu.memory_space<vmem>>, %arg10: memref<128x128xbf16, #tpu.memory_space<vmem>>, %arg11: memref<!tpu.dma_semaphore, #tpu.memory_space<semaphore_mem>>) attributes {dimension_semantics = [#tpu.dimension_semantics<arbitrary>, #tpu.dimension_semantics<arbitrary>], iteration_bounds = array<i64: 3, 1>, scalar_prefetch = 0 : i64, scratch_operands = 4 : i64, tpu.core_type = #tpu.core_type<tc>, window_params = [{}, {pipeline_mode = #tpu.pipeline_mode<synchronous>, transform_indices = @transform_1, window_bounds = array<i64: 128, 128>}, {pipeline_mode = #tpu.pipeline_mode<synchronous>, transform_indices = @transform_2, window_bounds = array<i64: 128, 128>}, {pipeline_mode = #tpu.pipeline_mode<synchronous>, transform_indices = @transform_3, window_bounds = array<i64: 2, 128, 128>}, {pipeline_mode = #tpu.pipeline_mode<synchronous>, transform_indices = @transform_4, window_bounds = array<i64: 3, 1, 128>}, {pipeline_mode = #tpu.pipeline_mode<synchronous>, transform_indices = @transform_5, window_bounds = array<i64: 128, 128>}]} {
    %c128_i32 = arith.constant 128 : i32
    %0 = arith.muli %arg1, %c128_i32 : i32
    %1 = tpu.assume_multiple %0, 128 : i32
    %c0_i32 = arith.constant 0 : i32
    %2 = arith.cmpi eq, %arg0, %c0_i32 : i32
    %c0_i32_0 = arith.constant 0 : i32
    %3 = arith.cmpi eq, %arg1, %c0_i32_0 : i32
    %4 = arith.andi %2, %3 : i1
    %5 = arith.extui %4 : i1 to i32
    %c0_i32_1 = arith.constant 0 : i32
    %6 = arith.cmpi ne, %5, %c0_i32_1 : i32
    scf.if %6 {
      tpu.enqueue_dma source(%arg2 : memref<128x128xf32, #tpu.memory_space<any>>) target(%arg8 : memref<128x128xf32, #tpu.memory_space<vmem>>) target_semaphore(%arg11 : memref<!tpu.dma_semaphore, #tpu.memory_space<semaphore_mem>>)
      tpu.wait_dma2 semaphore(%arg11 : memref<!tpu.dma_semaphore, #tpu.memory_space<semaphore_mem>>) src(%arg2 : memref<128x128xf32, #tpu.memory_space<any>>) dst(%arg8 : memref<128x128xf32, #tpu.memory_space<vmem>>)
      %c0 = arith.constant 0 : index
      %c0_16 = arith.constant 0 : index
      %33 = vector.load %arg8[%c0, %c0_16] : memref<128x128xf32, #tpu.memory_space<vmem>>, vector<128x128xf32>
      %c0_17 = arith.constant 0 : index
      %c0_18 = arith.constant 0 : index
      %34 = vector.load %arg4[%c0_17, %c0_18] : memref<128x128xf32, #tpu.memory_space<vmem>>, vector<128x128xf32>
      %cst = arith.constant dense<0.000000e+00> : vector<128x128xf32>
      %35 = tpu.matmul %33, %34, %cst {dimension_numbers = #tpu.dot_dimension_numbers<[1], [0], [0], [1], [0, 0, 1, 1], [], []>} : vector<128x128xf32>, vector<128x128xf32>, vector<128x128xf32> -> vector<128x128xf32>
      %36 = arith.truncf %35 : vector<128x128xf32> to vector<128x128xbf16>
      %c0_19 = arith.constant 0 : index
      %c0_20 = arith.constant 0 : index
      %37 = vector.load %arg9[%c0_19, %c0_20] : memref<128x128xbf16, #tpu.memory_space<vmem>>, vector<128x128xbf16>
      tpu.vector_store %arg9[%c0_19, %c0_20], %36 {strides = array<i32>} : memref<128x128xbf16, #tpu.memory_space<vmem>>, vector<128x128xbf16>,
    } else {
    }
    %c2_i32 = arith.constant 2 : i32
    %c0_i32_2 = arith.constant 0 : i32
    %7 = arith.cmpi eq, %c2_i32, %c0_i32_2 : i32
    %c1_i32 = arith.constant 1 : i32
    %8 = arith.select %7, %c1_i32, %c2_i32 : i32
    %9 = arith.remsi %arg0, %8 : i32
    %c0_i32_3 = arith.constant 0 : i32
    %10 = arith.cmpi ne, %9, %c0_i32_3 : i32
    %c0_i32_4 = arith.constant 0 : i32
    %11 = arith.cmpi slt, %9, %c0_i32_4 : i32
    %c0_i32_5 = arith.constant 0 : i32
    %12 = arith.cmpi slt, %8, %c0_i32_5 : i32
    %13 = arith.xori %11, %12 : i1
    %14 = arith.andi %13, %10 : i1
    %15 = arith.addi %9, %8 : i32
    %16 = arith.select %14, %15, %9 : i32
    %c0_i32_6 = arith.constant 0 : i32
    %17 = arith.cmpi eq, %16, %c0_i32_6 : i32
    %18 = arith.extui %17 : i1 to i32
    %c0_i32_7 = arith.constant 0 : i32
    %19 = arith.cmpi ne, %18, %c0_i32_7 : i32
    scf.if %19 {
      %33 = arith.index_cast %1 : i32 to index
      %c0 = arith.constant 0 : index
      %34 = vector.load %arg3[%33, %c0] : memref<128x128xbf16, #tpu.memory_space<vmem>>, vector<128x128xbf16>
      %c0_16 = arith.constant 0 : index
      %c0_17 = arith.constant 0 : index
      %35 = vector.load %arg9[%c0_16, %c0_17] : memref<128x128xbf16, #tpu.memory_space<vmem>>, vector<128x128xbf16>
      %cst = arith.constant dense<0.000000e+00> : vector<128x128xf32>
      %36 = tpu.matmul %34, %35, %cst {dimension_numbers = #tpu.dot_dimension_numbers<[1], [0], [0], [1], [0, 0, 1, 1], [], []>} : vector<128x128xbf16>, vector<128x128xbf16>, vector<128x128xf32> -> vector<128x128xf32>
      %37 = arith.index_cast %arg0 : i32 to index
      %c0_18 = arith.constant 0 : index
      %c0_19 = arith.constant 0 : index
      %38 = vector.load %arg6[%37, %c0_18, %c0_19] : memref<3x1x128xf32, #tpu.memory_space<vmem>>, vector<1x1x128xf32>
      %39 = vector.shape_cast %38 : vector<1x1x128xf32> to vector<1x128xf32>
      %40 = vector.broadcast %39 : vector<1x128xf32> to vector<128x128xf32>
      %41 = arith.addf %36, %40 : vector<128x128xf32>
      %cst_20 = arith.constant 0.000000e+00 : f32
      %42 = vector.broadcast %cst_20 : f32 to vector<128x128xf32>
      %43 = arith.cmpf oge, %41, %42 : vector<128x128xf32>
      %cst_21 = arith.constant 2.500000e-01 : f32
      %44 = vector.broadcast %cst_21 : f32 to vector<128x128xf32>
      %45 = arith.mulf %44, %41 : vector<128x128xf32>
      %46 = arith.select %43, %41, %45 : vector<128x128xi1>, vector<128x128xf32>
      %c2_i32_22 = arith.constant 2 : i32
      %47 = arith.cmpi slt, %arg0, %c2_i32_22 : i32
      %48 = arith.extui %47 : i1 to i32
      %c0_i32_23 = arith.constant 0 : i32
      %49 = arith.cmpi ne, %48, %c0_i32_23 : i32
      scf.if %49 {
        %53 = arith.index_cast %arg0 : i32 to index
        %c0_26 = arith.constant 0 : index
        %c0_27 = arith.constant 0 : index
        %54 = vector.load %arg5[%53, %c0_26, %c0_27] : memref<2x128x128xf32, #tpu.memory_space<vmem>>, vector<1x128x128xf32>
        %55 = vector.shape_cast %54 : vector<1x128x128xf32> to vector<128x128xf32>
        %cst_28 = arith.constant dense<0.000000e+00> : vector<128x128xf32>
        %56 = tpu.matmul %46, %55, %cst_28 {dimension_numbers = #tpu.dot_dimension_numbers<[1], [0], [0], [1], [0, 0, 1, 1], [], []>} : vector<128x128xf32>, vector<128x128xf32>, vector<128x128xf32> -> vector<128x128xf32>
        %57 = arith.truncf %56 : vector<128x128xf32> to vector<128x128xbf16>
        %58 = arith.index_cast %1 : i32 to index
        %c0_29 = arith.constant 0 : index
        %59 = vector.load %arg10[%58, %c0_29] : memref<128x128xbf16, #tpu.memory_space<vmem>>, vector<128x128xbf16>
        tpu.vector_store %arg10[%58, %c0_29], %57 {strides = array<i32>} : memref<128x128xbf16, #tpu.memory_space<vmem>>, vector<128x128xbf16>,
      } else {
      }
      %c2_i32_24 = arith.constant 2 : i32
      %50 = arith.cmpi eq, %arg0, %c2_i32_24 : i32
      %51 = arith.extui %50 : i1 to i32
      %c0_i32_25 = arith.constant 0 : i32
      %52 = arith.cmpi ne, %51, %c0_i32_25 : i32
      scf.if %52 {
        %53 = arith.index_cast %1 : i32 to index
        %c0_26 = arith.constant 0 : index
        %54 = vector.load %arg7[%53, %c0_26] : memref<128x128xf32, #tpu.memory_space<vmem>>, vector<128x128xf32>
        tpu.vector_store %arg7[%53, %c0_26], %46 {strides = array<i32>} : memref<128x128xf32, #tpu.memory_space<vmem>>, vector<128x128xf32>,
      } else {
      }
    } else {
    }
    %c2_i32_8 = arith.constant 2 : i32
    %c0_i32_9 = arith.constant 0 : i32
    %20 = arith.cmpi eq, %c2_i32_8, %c0_i32_9 : i32
    %c1_i32_10 = arith.constant 1 : i32
    %21 = arith.select %20, %c1_i32_10, %c2_i32_8 : i32
    %22 = arith.remsi %arg0, %21 : i32
    %c0_i32_11 = arith.constant 0 : i32
    %23 = arith.cmpi ne, %22, %c0_i32_11 : i32
    %c0_i32_12 = arith.constant 0 : i32
    %24 = arith.cmpi slt, %22, %c0_i32_12 : i32
    %c0_i32_13 = arith.constant 0 : i32
    %25 = arith.cmpi slt, %21, %c0_i32_13 : i32
    %26 = arith.xori %24, %25 : i1
    %27 = arith.andi %26, %23 : i1
    %28 = arith.addi %22, %21 : i32
    %29 = arith.select %27, %28, %22 : i32
    %c1_i32_14 = arith.constant 1 : i32
    %30 = arith.cmpi eq, %29, %c1_i32_14 : i32
    %31 = arith.extui %30 : i1 to i32
    %c0_i32_15 = arith.constant 0 : i32
    %32 = arith.cmpi ne, %31, %c0_i32_15 : i32
    scf.if %32 {
      %33 = arith.index_cast %1 : i32 to index
      %c0 = arith.constant 0 : index
      %34 = vector.load %arg3[%33, %c0] : memref<128x128xbf16, #tpu.memory_space<vmem>>, vector<128x128xbf16>
      %c0_16 = arith.constant 0 : index
      %c0_17 = arith.constant 0 : index
      %35 = vector.load %arg10[%c0_16, %c0_17] : memref<128x128xbf16, #tpu.memory_space<vmem>>, vector<128x128xbf16>
      %cst = arith.constant dense<0.000000e+00> : vector<128x128xf32>
      %36 = tpu.matmul %34, %35, %cst {dimension_numbers = #tpu.dot_dimension_numbers<[1], [0], [0], [1], [0, 0, 1, 1], [], []>} : vector<128x128xbf16>, vector<128x128xbf16>, vector<128x128xf32> -> vector<128x128xf32>
      %37 = arith.index_cast %arg0 : i32 to index
      %c0_18 = arith.constant 0 : index
      %c0_19 = arith.constant 0 : index
      %38 = vector.load %arg6[%37, %c0_18, %c0_19] : memref<3x1x128xf32, #tpu.memory_space<vmem>>, vector<1x1x128xf32>
      %39 = vector.shape_cast %38 : vector<1x1x128xf32> to vector<1x128xf32>
      %40 = vector.broadcast %39 : vector<1x128xf32> to vector<128x128xf32>
      %41 = arith.addf %36, %40 : vector<128x128xf32>
      %cst_20 = arith.constant 0.000000e+00 : f32
      %42 = vector.broadcast %cst_20 : f32 to vector<128x128xf32>
      %43 = arith.cmpf oge, %41, %42 : vector<128x128xf32>
      %cst_21 = arith.constant 2.500000e-01 : f32
      %44 = vector.broadcast %cst_21 : f32 to vector<128x128xf32>
      %45 = arith.mulf %44, %41 : vector<128x128xf32>
      %46 = arith.select %43, %41, %45 : vector<128x128xi1>, vector<128x128xf32>
      %c2_i32_22 = arith.constant 2 : i32
      %47 = arith.cmpi slt, %arg0, %c2_i32_22 : i32
      %48 = arith.extui %47 : i1 to i32
      %c0_i32_23 = arith.constant 0 : i32
      %49 = arith.cmpi ne, %48, %c0_i32_23 : i32
      scf.if %49 {
        %53 = arith.index_cast %arg0 : i32 to index
        %c0_26 = arith.constant 0 : index
        %c0_27 = arith.constant 0 : index
        %54 = vector.load %arg5[%53, %c0_26, %c0_27] : memref<2x128x128xf32, #tpu.memory_space<vmem>>, vector<1x128x128xf32>
        %55 = vector.shape_cast %54 : vector<1x128x128xf32> to vector<128x128xf32>
        %cst_28 = arith.constant dense<0.000000e+00> : vector<128x128xf32>
        %56 = tpu.matmul %46, %55, %cst_28 {dimension_numbers = #tpu.dot_dimension_numbers<[1], [0], [0], [1], [0, 0, 1, 1], [], []>} : vector<128x128xf32>, vector<128x128xf32>, vector<128x128xf32> -> vector<128x128xf32>
        %57 = arith.truncf %56 : vector<128x128xf32> to vector<128x128xbf16>
        %58 = arith.index_cast %1 : i32 to index
        %c0_29 = arith.constant 0 : index
        %59 = vector.load %arg9[%58, %c0_29] : memref<128x128xbf16, #tpu.memory_space<vmem>>, vector<128x128xbf16>
        tpu.vector_store %arg9[%58, %c0_29], %57 {strides = array<i32>} : memref<128x128xbf16, #tpu.memory_space<vmem>>, vector<128x128xbf16>,
      } else {
      }
      %c2_i32_24 = arith.constant 2 : i32
      %50 = arith.cmpi eq, %arg0, %c2_i32_24 : i32
      %51 = arith.extui %50 : i1 to i32
      %c0_i32_25 = arith.constant 0 : i32
      %52 = arith.cmpi ne, %51, %c0_i32_25 : i32
      scf.if %52 {
        %53 = arith.index_cast %1 : i32 to index
        %c0_26 = arith.constant 0 : index
        %54 = vector.load %arg7[%53, %c0_26] : memref<128x128xf32, #tpu.memory_space<vmem>>, vector<128x128xf32>
        tpu.vector_store %arg7[%53, %c0_26], %46 {strides = array<i32>} : memref<128x128xf32, #tpu.memory_space<vmem>>, vector<128x128xf32>,
      } else {
      }
    } else {
    }
    return
  }
  func.func @transform_1(%arg0: i32, %arg1: i32) -> (i32, i32) {
    %c0_i32 = arith.constant 0 : i32
    %c0_i32_0 = arith.constant 0 : i32
    %c0_i32_1 = arith.constant 0 : i32
    return %c0_i32, %c0_i32_0 : i32, i32
  }
  func.func @transform_2(%arg0: i32, %arg1: i32) -> (i32, i32) {
    %c0_i32 = arith.constant 0 : i32
    %c0_i32_0 = arith.constant 0 : i32
    %c0_i32_1 = arith.constant 0 : i32
    return %c0_i32, %c0_i32_0 : i32, i32
  }
  func.func @transform_3(%arg0: i32, %arg1: i32) -> (i32, i32, i32) {
    %c0_i32 = arith.constant 0 : i32
    %c0_i32_0 = arith.constant 0 : i32
    %c0_i32_1 = arith.constant 0 : i32
    %c0_i32_2 = arith.constant 0 : i32
    return %c0_i32, %c0_i32_0, %c0_i32_1 : i32, i32, i32
  }
  func.func @transform_4(%arg0: i32, %arg1: i32) -> (i32, i32, i32) {
    %c0_i32 = arith.constant 0 : i32
    %c0_i32_0 = arith.constant 0 : i32
    %c0_i32_1 = arith.constant 0 : i32
    %c0_i32_2 = arith.constant 0 : i32
    return %c0_i32, %c0_i32_0, %c0_i32_1 : i32, i32, i32
  }
  func.func @transform_5(%arg0: i32, %arg1: i32) -> (i32, i32) {
    %c0_i32 = arith.constant 0 : i32
    %c0_i32_0 = arith.constant 0 : i32
    %c0_i32_1 = arith.constant 0 : i32
    return %c0_i32, %c0_i32_0 : i32, i32
  }
}

</mosaic_0001>

<bundles_post_ra>
// kernel: tpu_custom_call.1
= control target key start
LH: loop header
LB: loop body
LE: loop exit
PB: predicated region body
PF: predicated region fallthrough
CT: control target
= control target key end

     0   :  { %10 = vsyncpa [#allocation7], 0  ;;  %s2378_s0 = inlined_call_operand.hbm [shape: f32[128,128], index: 0, kind: input, shape index: {}]   ;;  %s2379_s1 = inlined_call_operand.hbm [shape: bf16[128,128], index: 1, kind: input, shape index: {}]   ;;  %s2380_s2 = inlined_call_operand.hbm [shape: f32[128,128], index: 2, kind: input, shape index: {}]   ;;  %s2381_s3 = inlined_call_operand.hbm [shape: f32[2,128,128], index: 3, kind: input, shape index: {}]   ;;  %s2382_s4 = inlined_call_operand.vmem [shape: f32[3,1,128], index: 4, kind: input, shape index: {}]   ;;  %s2383_s5 = inlined_call_operand.hbm [shape: f32[128,128], index: 5, kind: output, shape index: {}]  }
   0x1   :  { %11 = vsyncpa [#allocation10], 0 }
   0x2   :  { %12 = vsyncpa [#allocation8], 0  ;;  %s2065_s18 = smov 0   ;;  %s2067_s19 = smov 0  }
   0x3   :  { %s2069_s20 = smov 0  }
   0x4 LB: > { %s165_s23 = sshll.u32 %s2380_s2, 4  ;;  %s1253_s24 = sadd.s32 4294967295, %s2022_s20   ;;  %s2022_s20 = sphi %s2069_s20, %s18_s20   ;;  %s2018_s19 = sphi %s2067_s19, %s2388_s19   ;;  %s2014_s18 = sphi %s2065_s18, %s2387_s18   ;;  %s166_s23 = int_to_ptr.hbm [resolvable:$true] %s165_s23 }
   0x5   : > { %p1254_p0 = scmp.ge.s32.totalorder %s2022_s20, 1  ;;  %p140_p1 = scmp.lt.s32.totalorder %s2022_s20, 4 }
   0x6   : > { %p2088_p2 = scmp.eq.s32.totalorder %s1253_s24, 0  ;;  %s2024_s27 = smov [#allocation9]  }
   0x7   : > { %p2092_p3 = pnand %p1254_p0, %p140_p1  ;;  %s167_s28 = sshll.u32 %s2024_s27, 4  ;;  %s168_s28 = int_to_ptr.vmem [resolvable:$true] %s167_s28 }
   0x8   : > { %s30_s30 = sadd.s32 1, %s2018_s19  ;;  %s2025_s6 = smov 128  }
   0x9   : > { %p1789_p4 = pneg %p2092_p3  ;;  %p32_p6 = scmp.ge.s32.totalorder %s30_s30, 3 }
   0xa   : > { %s2026_s7 = smov 8   ;;  %s151_s10 = sshll.u32 %s2379_s1, 4  ;;  %s152_s10 = int_to_ptr.hbm [resolvable:$true] %s151_s10 }
   0xb   : > { %p2100_p5 = pnand %p2088_p2, %p1789_p4  ;;  %s2390_s30 = smov (%p32_p6, %s30_s30), 0 }
   0xc   : > { %s2027_s11 = smov [#allocation6]   ;;  %s179_s15 = sshll.u32 %s2381_s3, 4  ;;  %s180_s15 = int_to_ptr.hbm [resolvable:$true] %s179_s15 }
   0xd   : > { %1795 = dma.hbm_to_vmem [thread:$0]  (!%p2100_p5), %s166_s23, 2048, %s168_s28, [#allocation10], %s2025_s6, %s2025_s6, %s2026_s7  }
   0xe   : > { %s153_s12 = sshll.u32 %s2027_s11, 4  ;;  %s2028_s16 = smov 64   ;;  %s154_s12 = int_to_ptr.vmem [resolvable:$true] %s153_s12 }
   0xf   : > { %s2029_s17 = smov 4   ;;  %s2030_s21 = smov [#allocation11]  }
  0x10   : > { %1792 = dma.hbm_to_vmem [thread:$0]  (!%p2100_p5), %s152_s10, 1024, %s154_s12, [#allocation7], %s2028_s16, %s2028_s16, %s2029_s17  }
  0x11   : > { %s181_s22 = sshll.u32 %s2030_s21, 4  ;;  %200 = sbr.rel (%p2092_p3) target bundleno = 1077 (0x435), region = 36  ;;  %s182_s22 = int_to_ptr.vmem [resolvable:$true] %s181_s22 }
  0x12   : > { %1798 = dma.hbm_to_vmem [thread:$0]  (!%p2100_p5), %s180_s15, 4096, %s182_s22, [#allocation10], %s2025_s6, %s2025_s6, %s2026_s7  }
  0x16   : > { %1999 = dma.done.wait (%p2088_p2), [#allocation7], 1024  }
  0x17   : > { %2001 = vsyncadd (%p2088_p2), [#allocation7], 4294966272 }
  0x18   : > { %2003 = dma.done.wait (%p2088_p2), [#allocation10], 6144  }
  0x19   : > { %2005 = vsyncadd (%p2088_p2), [#allocation10], 4294961152  ;;  %p228_p7 = scmp.eq.s32.totalorder %s2014_s18, 0 }
  0x1a   : > { %s241_s26 = sshll.u32 (%p228_p7), %s2378_s0, 4  ;;  %s2031_s28 = smov (%p228_p7), [#allocation2]   ;;  %s242_s26 = int_to_ptr.hbm [resolvable:$true] %s241_s26 }
  0x1b   : > { %233 = sbr.rel (!%p228_p7) target bundleno = 227 (0xe3), region = 52  ;;  %s243_s29 = sshll.u32 (%p228_p7), %s2031_s28, 4  ;;  %s244_s29 = int_to_ptr.vmem [resolvable:$true] %s243_s29 }
  0x1c   : > { %246 = dma.hbm_to_vmem [thread:$0]  (%p228_p7), %s242_s26, 2048, %s244_s29, [#allocation5] }
  0x20   : > { %2006 = dma.done.wait [#allocation5], 2048 }
  0x21   : > { %2007 = vsyncadd [#allocation5], 4294965248  ;;  %v281_v0 = vld [vmem:[#allocation9 + $0x78] sm:$0xff]  ;;  %v280_v1 = vld [vmem:[#allocation9 + $0x70] sm:$0xff] }
  0x22   : > { %282 = vmatpush.msra.mxu0 %v281_v0  ;;  %1581 = vmatpush.msra.mxu1 %v281_v0  ;;  %v279_v2 = vld [vmem:[#allocation9 + $0x68] sm:$0xff]  ;;  %v278_v3 = vld [vmem:[#allocation9 + $0x60] sm:$0xff]  ;;  %v277_v4 = vld [vmem:[#allocation9 + $0x58] sm:$0xff] }
  0x23   : > { %1582 = vmatpush.msra.mxu2 %v281_v0  ;;  %1583 = vmatpush.msra.mxu3 %v281_v0  ;;  %v276_v5 = vld [vmem:[#allocation9 + $0x50] sm:$0xff]  ;;  %v275_v6 = vld [vmem:[#allocation9 + $0x48] sm:$0xff]  ;;  %v274_v7 = vld [vmem:[#allocation9 + $0x40] sm:$0xff] }
  0x24   : > { %283 = vmatpush.msra.mxu0 %v280_v1  ;;  %1584 = vmatpush.msra.mxu1 %v280_v1  ;;  %v273_v8 = vld [vmem:[#allocation9 + $0x38] sm:$0xff]  ;;  %v272_v9 = vld [vmem:[#allocation9 + $0x30] sm:$0xff]  ;;  %v271_v10 = vld [vmem:[#allocation9 + $0x28] sm:$0xff] }
  0x25   : > { %1585 = vmatpush.msra.mxu2 %v280_v1  ;;  %1586 = vmatpush.msra.mxu3 %v280_v1  ;;  %v270_v11 = vld [vmem:[#allocation9 + $0x20] sm:$0xff]  ;;  %v269_v12 = vld [vmem:[#allocation9 + $0x18] sm:$0xff]  ;;  %v268_v13 = vld [vmem:[#allocation9 + $0x10] sm:$0xff] }
  0x26   : > { %284 = vmatpush.msra.mxu0 %v279_v2  ;;  %1587 = vmatpush.msra.mxu1 %v279_v2  ;;  %v267_v14 = vld [vmem:[#allocation9 + $0x8] sm:$0xff]  ;;  %v266_v15 = vld [vmem:[#allocation9] sm:$0xff]  ;;  %v252_v24 = vld [vmem:[#allocation2 + $0x10] sm:$0xff] }
  0x27   : > { %1588 = vmatpush.msra.mxu2 %v279_v2  ;;  %1589 = vmatpush.msra.mxu3 %v279_v2  ;;  %v250_v16 = vld [vmem:[#allocation2] sm:$0xff]  ;;  %v251_v20 = vld [vmem:[#allocation2 + $0x8] sm:$0xff]  ;;  %v256_v25 = vld [vmem:[#allocation2 + $0x30] sm:$0xff] }
  0x28   : > { %285 = vmatpush.msra.mxu0 %v278_v3  ;;  %1590 = vmatpush.msra.mxu1 %v278_v3  ;;  %v254_v17 = vld [vmem:[#allocation2 + $0x20] sm:$0xff]  ;;  %v255_v21 = vld [vmem:[#allocation2 + $0x28] sm:$0xff]  ;;  %v260_v26 = vld [vmem:[#allocation2 + $0x50] sm:$0xff] }
  0x29   : > { %1591 = vmatpush.msra.mxu2 %v278_v3  ;;  %1592 = vmatpush.msra.mxu3 %v278_v3  ;;  %v258_v18 = vld [vmem:[#allocation2 + $0x40] sm:$0xff]  ;;  %v259_v22 = vld [vmem:[#allocation2 + $0x48] sm:$0xff]  ;;  %v264_v27 = vld [vmem:[#allocation2 + $0x70] sm:$0xff] }
  0x2a   : > { %286 = vmatpush.msra.mxu0 %v277_v4  ;;  %1593 = vmatpush.msra.mxu1 %v277_v4  ;;  %v262_v19 = vld [vmem:[#allocation2 + $0x60] sm:$0xff]  ;;  %v263_v23 = vld [vmem:[#allocation2 + $0x68] sm:$0xff]  ;;  %v253_v28 = vld [vmem:[#allocation2 + $0x18] sm:$0xff] }
  0x2b   : > { %1594 = vmatpush.msra.mxu2 %v277_v4  ;;  %1595 = vmatpush.msra.mxu3 %v277_v4  ;;  %v257_v29 = vld [vmem:[#allocation2 + $0x38] sm:$0xff] }
  0x2c   : > { %287 = vmatpush.msra.mxu0 %v276_v5  ;;  %1596 = vmatpush.msra.mxu1 %v276_v5  ;;  %v261_v30 = vld [vmem:[#allocation2 + $0x58] sm:$0xff] }
  0x2d   : > { %1597 = vmatpush.msra.mxu2 %v276_v5  ;;  %1598 = vmatpush.msra.mxu3 %v276_v5  ;;  %v265_v31 = vld [vmem:[#allocation2 + $0x78] sm:$0xff] }
  0x2e   : > { %288 = vmatpush.msra.mxu0 %v275_v6  ;;  %1599 = vmatpush.msra.mxu1 %v275_v6 }
  0x2f   : > { %1600 = vmatpush.msra.mxu2 %v275_v6  ;;  %1601 = vmatpush.msra.mxu3 %v275_v6 }
  0x30   : > { %289 = vmatpush.msra.mxu0 %v274_v7  ;;  %1602 = vmatpush.msra.mxu1 %v274_v7 }
  0x31   : > { %1603 = vmatpush.msra.mxu2 %v274_v7  ;;  %1604 = vmatpush.msra.mxu3 %v274_v7 }
  0x32   : > { %290 = vmatpush.msra.mxu0 %v273_v8  ;;  %1605 = vmatpush.msra.mxu1 %v273_v8 }
  0x33   : > { %1606 = vmatpush.msra.mxu2 %v273_v8  ;;  %1607 = vmatpush.msra.mxu3 %v273_v8 }
  0x34   : > { %291 = vmatpush.msra.mxu0 %v272_v9  ;;  %1608 = vmatpush.msra.mxu1 %v272_v9 }
  0x35   : > { %1609 = vmatpush.msra.mxu2 %v272_v9  ;;  %1610 = vmatpush.msra.mxu3 %v272_v9 }
  0x36   : > { %292 = vmatpush.msra.mxu0 %v271_v10  ;;  %1611 = vmatpush.msra.mxu1 %v271_v10 }
  0x37   : > { %1612 = vmatpush.msra.mxu2 %v271_v10  ;;  %1613 = vmatpush.msra.mxu3 %v271_v10 }
  0x38   : > { %293 = vmatpush.msra.mxu0 %v270_v11  ;;  %1614 = vmatpush.msra.mxu1 %v270_v11 }
  0x39   : > { %1615 = vmatpush.msra.mxu2 %v270_v11  ;;  %1616 = vmatpush.msra.mxu3 %v270_v11 }
  0x3a   : > { %294 = vmatpush.msra.mxu0 %v269_v12  ;;  %1617 = vmatpush.msra.mxu1 %v269_v12 }
  0x3b   : > { %1618 = vmatpush.msra.mxu2 %v269_v12  ;;  %1619 = vmatpush.msra.mxu3 %v269_v12 }
  0x3c   : > { %295 = vmatpush.msra.mxu0 %v268_v13  ;;  %1620 = vmatpush.msra.mxu1 %v268_v13 }
  0x3d   : > { %1621 = vmatpush.msra.mxu2 %v268_v13  ;;  %1622 = vmatpush.msra.mxu3 %v268_v13 }
  0x3e   : > { %296 = vmatpush.msra.mxu0 %v267_v14  ;;  %1623 = vmatpush.msra.mxu1 %v267_v14 }
  0x3f   : > { %1624 = vmatpush.msra.mxu2 %v267_v14  ;;  %1625 = vmatpush.msra.mxu3 %v267_v14 }
  0x40   : > { %297 = vmatpush.msra.mxu0 %v266_v15  ;;  %1626 = vmatpush.msra.mxu1 %v266_v15 }
  0x41   : > { %1627 = vmatpush.msra.mxu2 %v266_v15  ;;  %1628 = vmatpush.msra.mxu3 %v266_v15 }
  0x42   : > { %298 = vmatmul.f32.vlgmr.msra.gmra.mxu0 %v250_v16  ;;  %310 = vmatmul.f32.vlgmr.msra.gmra.mxu1 %v254_v17 }
  0x43   : > { %322 = vmatmul.f32.vlgmr.msra.gmra.mxu2 %v258_v18  ;;  %334 = vmatmul.f32.vlgmr.msra.gmra.mxu3 %v262_v19 }
  0x4a   : > { %301 = vmatmul.f32.gmra.mxu0 %v251_v20  ;;  %313 = vmatmul.f32.gmra.mxu1 %v255_v21 }
  0x4b   : > { %325 = vmatmul.f32.gmra.mxu2 %v259_v22  ;;  %337 = vmatmul.f32.gmra.mxu3 %v263_v23 }
  0x52   : > { %304 = vmatmul.f32.gmra.mxu0 %v252_v24  ;;  %316 = vmatmul.f32.gmra.mxu1 %v256_v25 }
  0x53   : > { %328 = vmatmul.f32.gmra.mxu2 %v260_v26  ;;  %340 = vmatmul.f32.gmra.mxu3 %v264_v27 }
  0x5a   : > { %307 = vmatmul.f32.gmra.mxu0 %v253_v28  ;;  %319 = vmatmul.f32.gmra.mxu1 %v257_v29 }
  0x5b   : > { %331 = vmatmul.f32.gmra.mxu2 %v261_v30  ;;  %343 = vmatmul.f32.gmra.mxu3 %v265_v31 }
  0xbf   : > { %v299_v32 = vpop.f32.mrf.mxu0  ;;  %v311_v33 = vpop.f32.mrf.mxu1 }
  0xc6   : > { %v323_v34 = vpop.f32.mrf.mxu2  ;;  %v335_v35 = vpop.f32.mrf.mxu3 }
  0xc7   : > { %v302_v36 = vpop.f32.mrf.mxu0  ;;  %v314_v37 = vpop.f32.mrf.mxu1 }
  0xc8   : > { %v1443_v38 = vpack.c.bf16 %v302_v36, %v299_v32  ;;  %v1453_v39 = vpack.c.bf16 %v314_v37, %v311_v33 }
  0xca   : > { %1444 = vst [vmem:[#allocation3 + $0x30] sm:$0xff] %v1443_v38  }
  0xcb   : > { %1561 = vst [vmem:[#allocation3 + $0x18] sm:$0xff] %v1453_v39  }
  0xce   : > { %v326_v40 = vpop.f32.mrf.mxu2  ;;  %v338_v41 = vpop.f32.mrf.mxu3 }
  0xcf   : > { %v1463_v42 = vpack.c.bf16 %v326_v40, %v323_v34  ;;  %v1473_v43 = vpack.c.bf16 %v338_v41, %v335_v35  ;;  %v305_v44 = vpop.f32.mrf.mxu0  ;;  %v317_v45 = vpop.f32.mrf.mxu1 }
  0xd1   : > { %1563 = vst [vmem:[#allocation3 + $0x8] sm:$0xff] %v1463_v42  }
  0xd2   : > { %1565 = vst [vmem:[#allocation3 + $0x28] sm:$0xff] %v1473_v43  }
  0xd6   : > { %v329_v46 = vpop.f32.mrf.mxu2  ;;  %v341_v47 = vpop.f32.mrf.mxu3 }
  0xd7   : > { %v308_v48 = vpop.f32.mrf.mxu0  ;;  %v320_v49 = vpop.f32.mrf.mxu1 }
  0xd8   : > { %v1448_v50 = vpack.c.bf16 %v308_v48, %v305_v44  ;;  %v1458_v51 = vpack.c.bf16 %v320_v49, %v317_v45 }
  0xda   : > { %1560 = vst [vmem:[#allocation3] sm:$0xff] %v1448_v50  }
  0xdb   : > { %1562 = vst [vmem:[#allocation3 + $0x10] sm:$0xff] %v1458_v51  }
  0xde   : > { %v332_v52 = vpop.f32.mrf.mxu2  ;;  %v344_v53 = vpop.f32.mrf.mxu3 }
  0xdf   : > { %v1468_v54 = vpack.c.bf16 %v332_v52, %v329_v46  ;;  %v1478_v55 = vpack.c.bf16 %v344_v53, %v341_v47 }
  0xe1   : > { %1564 = vst [vmem:[#allocation3 + $0x20] sm:$0xff] %v1468_v54  }
  0xe2   : > { %1566 = vst [vmem:[#allocation3 + $0x38] sm:$0xff] %v1478_v55  }
  0xe3 PF: > { %p379_p8 = scmp.lt.s32.totalorder %s2014_s18, 0  ;;  %s380_s25 = ssub.s32 0, %s2014_s18 }
  0xe4   : > { %s1263_s6 = smin.u32 %s2014_s18, %s380_s25 }
  0xe5   : > { %s382_s7 = sand.u32 1, %s1263_s6  }
  0xe6   : > { %s383_s8 = ssub.s32 0, %s382_s7 }
  0xe7   : > { %s2392_s8 = smov (!%p379_p8, %s383_s8), %s382_s7 }
  0xe8   : > { %p1265_p9 = scmp.lt.s32.totalorder %s2392_s8, 0  ;;  %s389_s9 = sadd.s32 2, %s2392_s8 }
  0xea   : > { %s2394_s9 = smov (!%p1265_p9, %s389_s9), %s2392_s8 }
  0xeb   : > { %p1266_p10 = scmp.ne.s32.totalorder %s2394_s9, 0 }
  0xec   : > { %s431_s12 = scalar_lea.vmem (!%p1266_p10), %s2382_s4, %s2014_s18  ;;  %p1331_p11 = scmp.ge.s32.totalorder (!%p1266_p10), %s2014_s18, 2 }
  0xed   : > { %394 = sbr.rel (%p1266_p10) target bundleno = 653 (0x28d), region = 60 }
  0xf2   : > { %v1423_v56 = vld [vmem:[#allocation3 + $0x38] sm:$0xff]  ;;  %v1422_v57 = vld [vmem:[#allocation3 + $0x28] sm:$0xff]  ;;  %v1421_v58 = vld [vmem:[#allocation3 + $0x20] sm:$0xff]  ;;  %s1332_s15 = sshll.u32 (!%p1331_p11), %s2014_s18, 7 }
  0xf3   : > { %532 = vmatpush.bf16.msra.mxu0 %v1423_v56  ;;  %1629 = vmatpush.bf16.msra.mxu1 %v1423_v56  ;;  %v1420_v59 = vld [vmem:[#allocation3 + $0x8] sm:$0xff]  ;;  %v1419_v60 = vld [vmem:[#allocation3 + $0x10] sm:$0xff]  ;;  %v1418_v61 = vld [vmem:[#allocation3 + $0x18] sm:$0xff]  ;;  %s2200_s16 = scalar_lea.vmem (!%p1331_p11), [#allocation11], %s1332_s15 }
  0xf4   : > { %1630 = vmatpush.bf16.msra.mxu2 %v1423_v56  ;;  %1631 = vmatpush.bf16.msra.mxu3 %v1423_v56  ;;  %v1417_v62 = vld [vmem:[#allocation3] sm:$0xff]  ;;  %v1416_v63 = vld [vmem:[#allocation3 + $0x30] sm:$0xff]  ;;  %v1409_v4 = vld [vmem:[#allocation6 + $0x8] sm:$0xff] }
  0xf5   : > { %v1408_v0 = vld [vmem:[#allocation6] sm:$0xff]  ;;  %v1410_v1 = vld [vmem:[#allocation6 + $0x10] sm:$0xff]  ;;  %v1411_v5 = vld [vmem:[#allocation6 + $0x18] sm:$0xff] }
  0xf6   : > { %v1412_v2 = vld [vmem:[#allocation6 + $0x20] sm:$0xff]  ;;  %v1414_v3 = vld [vmem:[#allocation6 + $0x30] sm:$0xff]  ;;  %v1413_v6 = vld [vmem:[#allocation6 + $0x28] sm:$0xff] }
  0xf7   : > { %533 = vmatpush.bf16.msra.mxu0 %v1422_v57  ;;  %1632 = vmatpush.bf16.msra.mxu1 %v1422_v57  ;;  %v1415_v7 = vld [vmem:[#allocation6 + $0x38] sm:$0xff]  ;;  %v2148_v8 = vld [vmem:[%s431_s12] ss:$0 sm:$0xff] }
  0xf8   : > { %1633 = vmatpush.bf16.msra.mxu2 %v1422_v57  ;;  %1634 = vmatpush.bf16.msra.mxu3 %v1422_v57 }
  0xfb   : > { %534 = vmatpush.bf16.msra.mxu0 %v1421_v58  ;;  %1635 = vmatpush.bf16.msra.mxu1 %v1421_v58 }
  0xfc   : > { %1636 = vmatpush.bf16.msra.mxu2 %v1421_v58  ;;  %1637 = vmatpush.bf16.msra.mxu3 %v1421_v58 }
  0xff   : > { %535 = vmatpush.bf16.msra.mxu0 %v1420_v59  ;;  %1638 = vmatpush.bf16.msra.mxu1 %v1420_v59 }
 0x100   : > { %1639 = vmatpush.bf16.msra.mxu2 %v1420_v59  ;;  %1640 = vmatpush.bf16.msra.mxu3 %v1420_v59 }
 0x103   : > { %536 = vmatpush.bf16.msra.mxu0 %v1419_v60  ;;  %1641 = vmatpush.bf16.msra.mxu1 %v1419_v60 }
 0x104   : > { %1642 = vmatpush.bf16.msra.mxu2 %v1419_v60  ;;  %1643 = vmatpush.bf16.msra.mxu3 %v1419_v60 }
 0x107   : > { %537 = vmatpush.bf16.msra.mxu0 %v1418_v61  ;;  %1644 = vmatpush.bf16.msra.mxu1 %v1418_v61 }
 0x108   : > { %1645 = vmatpush.bf16.msra.mxu2 %v1418_v61  ;;  %1646 = vmatpush.bf16.msra.mxu3 %v1418_v61 }
 0x10b   : > { %538 = vmatpush.bf16.msra.mxu0 %v1417_v62  ;;  %1647 = vmatpush.bf16.msra.mxu1 %v1417_v62 }
 0x10c   : > { %1648 = vmatpush.bf16.msra.mxu2 %v1417_v62  ;;  %1649 = vmatpush.bf16.msra.mxu3 %v1417_v62 }
 0x10f   : > { %539 = vmatpush.bf16.msra.mxu0 %v1416_v63  ;;  %1650 = vmatpush.bf16.msra.mxu1 %v1416_v63 }
 0x110   : > { %1651 = vmatpush.bf16.msra.mxu2 %v1416_v63  ;;  %1652 = vmatpush.bf16.msra.mxu3 %v1416_v63 }
 0x112   : > { %540 = vmatmul.bf16.vlgmr.msra.gmra.mxu0 %v1408_v0  ;;  %550 = vmatmul.bf16.vlgmr.msra.gmra.mxu1 %v1410_v1 }
 0x113   : > { %560 = vmatmul.bf16.vlgmr.msra.gmra.mxu2 %v1412_v2  ;;  %570 = vmatmul.bf16.vlgmr.msra.gmra.mxu3 %v1414_v3 }
 0x122   : > { %545 = vmatmul.bf16.gmra.mxu0 %v1409_v4  ;;  %555 = vmatmul.bf16.gmra.mxu1 %v1411_v5 }
 0x123   : > { %565 = vmatmul.bf16.gmra.mxu2 %v1413_v6  ;;  %575 = vmatmul.bf16.gmra.mxu3 %v1415_v7 }
 0x18f   : > { %v541_v9 = vpop.f32.mrf.mxu0  ;;  %v551_v10 = vpop.f32.mrf.mxu1 }
 0x190   : > { %v542_v11 = vadd.f32 %v2148_v8, %v541_v9  ;;  %v552_v12 = vadd.f32 %v2148_v8, %v551_v10 }
 0x192   : > { %vm581_vm0 = vcmp.ge.f32.partialorder %v542_v11, 0.0  ;;  %v597_v13 = vmul.f32 0.25, %v542_v11  ;;  %vm585_vm1 = vcmp.ge.f32.partialorder %v552_v12, 0.0  ;;  %v601_v14 = vmul.f32 0.25, %v552_v12 }
 0x194   : > { %v2152_v15 = vsel %vm581_vm0, %v542_v11, %v597_v13  ;;  %v2154_v16 = vsel %vm585_vm1, %v552_v12, %v601_v14 }
 0x196   : > { %v561_v17 = vpop.f32.mrf.mxu2  ;;  %v571_v18 = vpop.f32.mrf.mxu3 }
 0x197   : > { %v562_v19 = vadd.f32 %v2148_v8, %v561_v17  ;;  %v572_v20 = vadd.f32 %v2148_v8, %v571_v18  ;;  %v543_v21 = vpop.f32.mrf.mxu0  ;;  %v553_v22 = vpop.f32.mrf.mxu1 }
 0x198   : > { %v544_v23 = vadd.f32 %v2148_v8, %v543_v21  ;;  %v554_v24 = vadd.f32 %v2148_v8, %v553_v22 }
 0x199   : > { %vm589_vm2 = vcmp.ge.f32.partialorder %v562_v19, 0.0  ;;  %v605_v25 = vmul.f32 0.25, %v562_v19  ;;  %vm593_vm3 = vcmp.ge.f32.partialorder %v572_v20, 0.0  ;;  %v609_v26 = vmul.f32 0.25, %v572_v20 }
 0x19a   : > { %vm582_vm4 = vcmp.ge.f32.partialorder %v544_v23, 0.0  ;;  %v598_v27 = vmul.f32 0.25, %v544_v23  ;;  %vm586_vm5 = vcmp.ge.f32.partialorder %v554_v24, 0.0  ;;  %v602_v28 = vmul.f32 0.25, %v554_v24 }
 0x19b   : > { %v2160_v29 = vsel %vm589_vm2, %v562_v19, %v605_v25  ;;  %v2162_v30 = vsel %vm593_vm3, %v572_v20, %v609_v26 }
 0x19c   : > { %v2164_v31 = vsel %vm582_vm4, %v544_v23, %v598_v27  ;;  %v2166_v32 = vsel %vm586_vm5, %v554_v24, %v602_v28 }
 0x19e   : > { %v563_v33 = vpop.f32.mrf.mxu2  ;;  %v573_v34 = vpop.f32.mrf.mxu3 }
 0x19f   : > { %v564_v35 = vadd.f32 %v2148_v8, %v563_v33  ;;  %v574_v36 = vadd.f32 %v2148_v8, %v573_v34  ;;  %v546_v37 = vpop.f32.mrf.mxu0  ;;  %v556_v38 = vpop.f32.mrf.mxu1 }
 0x1a0   : > { %v547_v39 = vadd.f32 %v2148_v8, %v546_v37  ;;  %v557_v40 = vadd.f32 %v2148_v8, %v556_v38 }
 0x1a1   : > { %vm590_vm6 = vcmp.ge.f32.partialorder %v564_v35, 0.0  ;;  %v606_v41 = vmul.f32 0.25, %v564_v35  ;;  %vm594_vm7 = vcmp.ge.f32.partialorder %v574_v36, 0.0  ;;  %v610_v42 = vmul.f32 0.25, %v574_v36 }
 0x1a2   : > { %vm583_vm8 = vcmp.ge.f32.partialorder %v547_v39, 0.0  ;;  %v599_v43 = vmul.f32 0.25, %v547_v39  ;;  %vm587_vm9 = vcmp.ge.f32.partialorder %v557_v40, 0.0  ;;  %v603_v44 = vmul.f32 0.25, %v557_v40 }
 0x1a3   : > { %v2172_v45 = vsel %vm590_vm6, %v564_v35, %v606_v41  ;;  %v2174_v46 = vsel %vm594_vm7, %v574_v36, %v610_v42 }
 0x1a4   : > { %v2176_v47 = vsel %vm583_vm8, %v547_v39, %v599_v43  ;;  %v2178_v48 = vsel %vm587_vm9, %v557_v40, %v603_v44 }
 0x1a6   : > { %v566_v49 = vpop.f32.mrf.mxu2  ;;  %v576_v50 = vpop.f32.mrf.mxu3 }
 0x1a7   : > { %v567_v51 = vadd.f32 %v2148_v8, %v566_v49  ;;  %v577_v52 = vadd.f32 %v2148_v8, %v576_v50  ;;  %v548_v53 = vpop.f32.mrf.mxu0  ;;  %v558_v54 = vpop.f32.mrf.mxu1 }
 0x1a8   : > { %v549_v55 = vadd.f32 %v2148_v8, %v548_v53  ;;  %v559_v56 = vadd.f32 %v2148_v8, %v558_v54 }
 0x1a9   : > { %vm591_vm10 = vcmp.ge.f32.partialorder %v567_v51, 0.0  ;;  %v607_v57 = vmul.f32 0.25, %v567_v51  ;;  %vm595_vm11 = vcmp.ge.f32.partialorder %v577_v52, 0.0  ;;  %v611_v58 = vmul.f32 0.25, %v577_v52 }
 0x1aa   : > { %vm584_vm12 = vcmp.ge.f32.partialorder %v549_v55, 0.0  ;;  %v600_v59 = vmul.f32 0.25, %v549_v55  ;;  %vm588_vm13 = vcmp.ge.f32.partialorder %v559_v56, 0.0  ;;  %v604_v60 = vmul.f32 0.25, %v559_v56 }
 0x1ab   : > { %v2184_v61 = vsel %vm591_vm10, %v567_v51, %v607_v57  ;;  %v2186_v62 = vsel %vm595_vm11, %v577_v52, %v611_v58 }
 0x1ac   : > { %v2188_v63 = vsel %vm584_vm12, %v549_v55, %v600_v59  ;;  %v2190_v0 = vsel %vm588_vm13, %v559_v56, %v604_v60 }
 0x1ae   : > { %v568_v1 = vpop.f32.mrf.mxu2  ;;  %v578_v2 = vpop.f32.mrf.mxu3 }
 0x1af   : > { %v569_v3 = vadd.f32 %v2148_v8, %v568_v1  ;;  %v579_v4 = vadd.f32 %v2148_v8, %v578_v2  ;;  %632 = sbr.rel (%p1331_p11) target bundleno = 630 (0x276), region = 64 }
 0x1b1   : > { %vm592_vm14 = vcmp.ge.f32.partialorder %v569_v3, 0.0  ;;  %v608_v5 = vmul.f32 0.25, %v569_v3  ;;  %vm596_vm15 = vcmp.ge.f32.partialorder %v579_v4, 0.0  ;;  %v612_v6 = vmul.f32 0.25, %v579_v4 }
 0x1b3   : > { %v2194_v7 = vsel %vm592_vm14, %v569_v3, %v608_v5  ;;  %v2196_v9 = vsel %vm596_vm15, %v579_v4, %v612_v6 }
 0x1b4   : > { %v650_v8 = vld [vmem:[%s2200_s16 + $0x78] sm:$0xff]  ;;  %v649_v10 = vld [vmem:[%s2200_s16 + $0x70] sm:$0xff]  ;;  %v648_v11 = vld [vmem:[%s2200_s16 + $0x68] sm:$0xff] }
 0x1b5   : > { %651 = vmatpush.msra.mxu0 %v650_v8  ;;  %1653 = vmatpush.msra.mxu1 %v650_v8  ;;  %v647_v12 = vld [vmem:[%s2200_s16 + $0x60] sm:$0xff]  ;;  %v646_v13 = vld [vmem:[%s2200_s16 + $0x58] sm:$0xff]  ;;  %v645_v14 = vld [vmem:[%s2200_s16 + $0x50] sm:$0xff] }
 0x1b6   : > { %1654 = vmatpush.msra.mxu2 %v650_v8  ;;  %1655 = vmatpush.msra.mxu3 %v650_v8  ;;  %v644_v17 = vld [vmem:[%s2200_s16 + $0x48] sm:$0xff]  ;;  %v643_v18 = vld [vmem:[%s2200_s16 + $0x40] sm:$0xff]  ;;  %v642_v19 = vld [vmem:[%s2200_s16 + $0x38] sm:$0xff] }
 0x1b7   : > { %652 = vmatpush.msra.mxu0 %v649_v10  ;;  %1656 = vmatpush.msra.mxu1 %v649_v10  ;;  %v641_v20 = vld [vmem:[%s2200_s16 + $0x30] sm:$0xff]  ;;  %v640_v21 = vld [vmem:[%s2200_s16 + $0x28] sm:$0xff]  ;;  %v639_v22 = vld [vmem:[%s2200_s16 + $0x20] sm:$0xff] }
 0x1b8   : > { %1657 = vmatpush.msra.mxu2 %v649_v10  ;;  %1658 = vmatpush.msra.mxu3 %v649_v10  ;;  %v638_v23 = vld [vmem:[%s2200_s16 + $0x18] sm:$0xff]  ;;  %v637_v24 = vld [vmem:[%s2200_s16 + $0x10] sm:$0xff]  ;;  %v636_v25 = vld [vmem:[%s2200_s16 + $0x8] sm:$0xff] }
 0x1b9   : > { %653 = vmatpush.msra.mxu0 %v648_v11  ;;  %1659 = vmatpush.msra.mxu1 %v648_v11  ;;  %v635_v26 = vld [vmem:[%s2200_s16] sm:$0xff] }
 0x1ba   : > { %1660 = vmatpush.msra.mxu2 %v648_v11  ;;  %1661 = vmatpush.msra.mxu3 %v648_v11 }
 0x1bb   : > { %654 = vmatpush.msra.mxu0 %v647_v12  ;;  %1662 = vmatpush.msra.mxu1 %v647_v12 }
 0x1bc   : > { %1663 = vmatpush.msra.mxu2 %v647_v12  ;;  %1664 = vmatpush.msra.mxu3 %v647_v12 }
 0x1bd   : > { %655 = vmatpush.msra.mxu0 %v646_v13  ;;  %1665 = vmatpush.msra.mxu1 %v646_v13 }
 0x1be   : > { %1666 = vmatpush.msra.mxu2 %v646_v13  ;;  %1667 = vmatpush.msra.mxu3 %v646_v13 }
 0x1bf   : > { %656 = vmatpush.msra.mxu0 %v645_v14  ;;  %1668 = vmatpush.msra.mxu1 %v645_v14 }
 0x1c0   : > { %1669 = vmatpush.msra.mxu2 %v645_v14  ;;  %1670 = vmatpush.msra.mxu3 %v645_v14 }
 0x1c1   : > { %657 = vmatpush.msra.mxu0 %v644_v17  ;;  %1671 = vmatpush.msra.mxu1 %v644_v17 }
 0x1c2   : > { %1672 = vmatpush.msra.mxu2 %v644_v17  ;;  %1673 = vmatpush.msra.mxu3 %v644_v17 }
 0x1c3   : > { %658 = vmatpush.msra.mxu0 %v643_v18  ;;  %1674 = vmatpush.msra.mxu1 %v643_v18 }
 0x1c4   : > { %1675 = vmatpush.msra.mxu2 %v643_v18  ;;  %1676 = vmatpush.msra.mxu3 %v643_v18 }
 0x1c5   : > { %659 = vmatpush.msra.mxu0 %v642_v19  ;;  %1677 = vmatpush.msra.mxu1 %v642_v19 }
 0x1c6   : > { %1678 = vmatpush.msra.mxu2 %v642_v19  ;;  %1679 = vmatpush.msra.mxu3 %v642_v19 }
 0x1c7   : > { %660 = vmatpush.msra.mxu0 %v641_v20  ;;  %1680 = vmatpush.msra.mxu1 %v641_v20 }
 0x1c8   : > { %1681 = vmatpush.msra.mxu2 %v641_v20  ;;  %1682 = vmatpush.msra.mxu3 %v641_v20 }
 0x1c9   : > { %661 = vmatpush.msra.mxu0 %v640_v21  ;;  %1683 = vmatpush.msra.mxu1 %v640_v21 }
 0x1ca   : > { %1684 = vmatpush.msra.mxu2 %v640_v21  ;;  %1685 = vmatpush.msra.mxu3 %v640_v21 }
 0x1cb   : > { %662 = vmatpush.msra.mxu0 %v639_v22  ;;  %1686 = vmatpush.msra.mxu1 %v639_v22 }
 0x1cc   : > { %1687 = vmatpush.msra.mxu2 %v639_v22  ;;  %1688 = vmatpush.msra.mxu3 %v639_v22 }
 0x1cd   : > { %663 = vmatpush.msra.mxu0 %v638_v23  ;;  %1689 = vmatpush.msra.mxu1 %v638_v23 }
 0x1ce   : > { %1690 = vmatpush.msra.mxu2 %v638_v23  ;;  %1691 = vmatpush.msra.mxu3 %v638_v23 }
 0x1cf   : > { %664 = vmatpush.msra.mxu0 %v637_v24  ;;  %1692 = vmatpush.msra.mxu1 %v637_v24 }
 0x1d0   : > { %1693 = vmatpush.msra.mxu2 %v637_v24  ;;  %1694 = vmatpush.msra.mxu3 %v637_v24 }
 0x1d1   : > { %665 = vmatpush.msra.mxu0 %v636_v25  ;;  %1695 = vmatpush.msra.mxu1 %v636_v25 }
 0x1d2   : > { %1696 = vmatpush.msra.mxu2 %v636_v25  ;;  %1697 = vmatpush.msra.mxu3 %v636_v25 }
 0x1d3   : > { %666 = vmatpush.msra.mxu0 %v635_v26  ;;  %1698 = vmatpush.msra.mxu1 %v635_v26 }
 0x1d4   : > { %1699 = vmatpush.msra.mxu2 %v635_v26  ;;  %1700 = vmatpush.msra.mxu3 %v635_v26 }
 0x1d5   : > { %667 = vmatmul.f32.vlgmr.msra.gmra.mxu0 %v2152_v15  ;;  %679 = vmatmul.f32.vlgmr.msra.gmra.mxu1 %v2154_v16 }
 0x1d6   : > { %691 = vmatmul.f32.vlgmr.msra.gmra.mxu2 %v2160_v29  ;;  %703 = vmatmul.f32.vlgmr.msra.gmra.mxu3 %v2162_v30 }
 0x1dd   : > { %670 = vmatmul.f32.gmra.mxu0 %v2164_v31  ;;  %682 = vmatmul.f32.gmra.mxu1 %v2166_v32 }
 0x1de   : > { %694 = vmatmul.f32.gmra.mxu2 %v2172_v45  ;;  %706 = vmatmul.f32.gmra.mxu3 %v2174_v46 }
 0x1e5   : > { %673 = vmatmul.f32.gmra.mxu0 %v2176_v47  ;;  %685 = vmatmul.f32.gmra.mxu1 %v2178_v48 }
 0x1e6   : > { %697 = vmatmul.f32.gmra.mxu2 %v2184_v61  ;;  %709 = vmatmul.f32.gmra.mxu3 %v2186_v62 }
 0x1ed   : > { %676 = vmatmul.f32.gmra.mxu0 %v2188_v63  ;;  %688 = vmatmul.f32.gmra.mxu1 %v2190_v0 }
 0x1ee   : > { %700 = vmatmul.f32.gmra.mxu2 %v2194_v7  ;;  %712 = vmatmul.f32.gmra.mxu3 %v2196_v9 }
 0x252   : > { %v668_v27 = vpop.f32.mrf.mxu0  ;;  %v680_v28 = vpop.f32.mrf.mxu1 }
 0x259   : > { %v692_v33 = vpop.f32.mrf.mxu2  ;;  %v704_v34 = vpop.f32.mrf.mxu3 }
 0x25a   : > { %v671_v35 = vpop.f32.mrf.mxu0  ;;  %v683_v36 = vpop.f32.mrf.mxu1 }
 0x25b   : > { %v1483_v37 = vpack.c.bf16 %v671_v35, %v668_v27  ;;  %v1493_v38 = vpack.c.bf16 %v683_v36, %v680_v28 }
 0x25d   : > { %1484 = vst [vmem:[#allocation4] sm:$0xff] %v1483_v37  }
 0x25e   : > { %1568 = vst [vmem:[#allocation4 + $0x10] sm:$0xff] %v1493_v38  }
 0x261   : > { %v695_v39 = vpop.f32.mrf.mxu2  ;;  %v707_v40 = vpop.f32.mrf.mxu3 }
 0x262   : > { %v1503_v41 = vpack.c.bf16 %v695_v39, %v692_v33  ;;  %v1513_v42 = vpack.c.bf16 %v707_v40, %v704_v34  ;;  %v674_v43 = vpop.f32.mrf.mxu0  ;;  %v686_v44 = vpop.f32.mrf.mxu1 }
 0x264   : > { %1570 = vst [vmem:[#allocation4 + $0x28] sm:$0xff] %v1503_v41  }
 0x265   : > { %1572 = vst [vmem:[#allocation4 + $0x30] sm:$0xff] %v1513_v42  }
 0x269   : > { %v698_v49 = vpop.f32.mrf.mxu2  ;;  %v710_v50 = vpop.f32.mrf.mxu3 }
 0x26a   : > { %v677_v51 = vpop.f32.mrf.mxu0  ;;  %v689_v52 = vpop.f32.mrf.mxu1 }
 0x26b   : > { %v1488_v53 = vpack.c.bf16 %v677_v51, %v674_v43  ;;  %v1498_v54 = vpack.c.bf16 %v689_v52, %v686_v44 }
 0x26d   : > { %1567 = vst [vmem:[#allocation4 + $0x18] sm:$0xff] %v1488_v53  }
 0x26e   : > { %1569 = vst [vmem:[#allocation4 + $0x20] sm:$0xff] %v1498_v54  }
 0x271   : > { %v701_v55 = vpop.f32.mrf.mxu2  ;;  %v713_v56 = vpop.f32.mrf.mxu3 }
 0x272   : > { %v1508_v57 = vpack.c.bf16 %v701_v55, %v698_v49  ;;  %v1518_v58 = vpack.c.bf16 %v713_v56, %v710_v50 }
 0x274   : > { %1571 = vst [vmem:[#allocation4 + $0x8] sm:$0xff] %v1508_v57  }
 0x275   : > { %1573 = vst [vmem:[#allocation4 + $0x38] sm:$0xff] %v1518_v58  }
 0x276 PF: > { %p1333_p12 = scmp.ne.s32.totalorder %s2014_s18, 2 }
 0x278   : > { %753 = sbr.rel (%p1333_p12) target bundleno = 653 (0x28d), region = 68 }
 0x27d   : > { %755 = vst [vmem:[#allocation12] sm:$0xff] %v2152_v15 }
 0x27e   : > { %756 = vst [vmem:[#allocation12 + $0x8] sm:$0xff] %v2164_v31 }
 0x27f   : > { %757 = vst [vmem:[#allocation12 + $0x10] sm:$0xff] %v2176_v47 }
 0x280   : > { %758 = vst [vmem:[#allocation12 + $0x18] sm:$0xff] %v2188_v63 }
 0x281   : > { %759 = vst [vmem:[#allocation12 + $0x20] sm:$0xff] %v2154_v16 }
 0x282   : > { %760 = vst [vmem:[#allocation12 + $0x28] sm:$0xff] %v2166_v32 }
 0x283   : > { %761 = vst [vmem:[#allocation12 + $0x30] sm:$0xff] %v2178_v48 }
 0x284   : > { %762 = vst [vmem:[#allocation12 + $0x38] sm:$0xff] %v2190_v0 }
 0x285   : > { %763 = vst [vmem:[#allocation12 + $0x40] sm:$0xff] %v2160_v29 }
 0x286   : > { %764 = vst [vmem:[#allocation12 + $0x48] sm:$0xff] %v2172_v45 }
 0x287   : > { %765 = vst [vmem:[#allocation12 + $0x50] sm:$0xff] %v2184_v61 }
 0x288   : > { %766 = vst [vmem:[#allocation12 + $0x58] sm:$0xff] %v2194_v7 }
 0x289   : > { %767 = vst [vmem:[#allocation12 + $0x60] sm:$0xff] %v2162_v30 }
 0x28a   : > { %768 = vst [vmem:[#allocation12 + $0x68] sm:$0xff] %v2174_v46 }
 0x28b   : > { %769 = vst [vmem:[#allocation12 + $0x70] sm:$0xff] %v2186_v62 }
 0x28c   : > { %770 = vst [vmem:[#allocation12 + $0x78] sm:$0xff] %v2196_v9 }
 0x28d PF: > { %p1334_p13 = scmp.ne.s32.totalorder %s2394_s9, 1 }
 0x28e   : > { %s811_s22 = scalar_lea.vmem (!%p1334_p13), %s2382_s4, %s2014_s18  ;;  %p1399_p0 = scmp.ge.s32.totalorder (!%p1334_p13), %s2014_s18, 2 }
 0x28f   : > { %774 = sbr.rel (%p1334_p13) target bundleno = 1071 (0x42f), region = 72 }
 0x294   : > { %v1439_v15 = vld [vmem:[#allocation4 + $0x38] sm:$0xff]  ;;  %v1438_v16 = vld [vmem:[#allocation4 + $0x30] sm:$0xff]  ;;  %v1437_v29 = vld [vmem:[#allocation4 + $0x8] sm:$0xff]  ;;  %s1400_s26 = sshll.u32 (!%p1399_p0), %s2014_s18, 7 }
 0x295   : > { %912 = vmatpush.bf16.msra.mxu0 %v1439_v15  ;;  %1701 = vmatpush.bf16.msra.mxu1 %v1439_v15  ;;  %v1436_v30 = vld [vmem:[#allocation4 + $0x28] sm:$0xff]  ;;  %v1435_v31 = vld [vmem:[#allocation4 + $0x20] sm:$0xff]  ;;  %v1434_v32 = vld [vmem:[#allocation4 + $0x10] sm:$0xff]  ;;  %s2313_s28 = scalar_lea.vmem (!%p1399_p0), [#allocation11], %s1400_s26 }
 0x296   : > { %1702 = vmatpush.bf16.msra.mxu2 %v1439_v15  ;;  %1703 = vmatpush.bf16.msra.mxu3 %v1439_v15  ;;  %v1433_v45 = vld [vmem:[#allocation4 + $0x18] sm:$0xff]  ;;  %v1432_v46 = vld [vmem:[#allocation4] sm:$0xff]  ;;  %v1426_v48 = vld [vmem:[#allocation6 + $0x10] sm:$0xff] }
 0x297   : > { %v1424_v47 = vld [vmem:[#allocation6] sm:$0xff]  ;;  %v1430_v60 = vld [vmem:[#allocation6 + $0x30] sm:$0xff]  ;;  %v1425_v61 = vld [vmem:[#allocation6 + $0x8] sm:$0xff] }
 0x298   : > { %v1428_v59 = vld [vmem:[#allocation6 + $0x20] sm:$0xff]  ;;  %v1427_v62 = vld [vmem:[#allocation6 + $0x18] sm:$0xff]  ;;  %v1429_v63 = vld [vmem:[#allocation6 + $0x28] sm:$0xff] }
 0x299   : > { %913 = vmatpush.bf16.msra.mxu0 %v1438_v16  ;;  %1704 = vmatpush.bf16.msra.mxu1 %v1438_v16  ;;  %v1431_v0 = vld [vmem:[#allocation6 + $0x38] sm:$0xff]  ;;  %v2261_v1 = vld [vmem:[%s811_s22] ss:$0 sm:$0xff] }
 0x29a   : > { %1705 = vmatpush.bf16.msra.mxu2 %v1438_v16  ;;  %1706 = vmatpush.bf16.msra.mxu3 %v1438_v16 }
 0x29d   : > { %914 = vmatpush.bf16.msra.mxu0 %v1437_v29  ;;  %1707 = vmatpush.bf16.msra.mxu1 %v1437_v29 }
 0x29e   : > { %1708 = vmatpush.bf16.msra.mxu2 %v1437_v29  ;;  %1709 = vmatpush.bf16.msra.mxu3 %v1437_v29 }
 0x2a1   : > { %915 = vmatpush.bf16.msra.mxu0 %v1436_v30  ;;  %1710 = vmatpush.bf16.msra.mxu1 %v1436_v30 }
 0x2a2   : > { %1711 = vmatpush.bf16.msra.mxu2 %v1436_v30  ;;  %1712 = vmatpush.bf16.msra.mxu3 %v1436_v30 }
 0x2a5   : > { %916 = vmatpush.bf16.msra.mxu0 %v1435_v31  ;;  %1713 = vmatpush.bf16.msra.mxu1 %v1435_v31 }
 0x2a6   : > { %1714 = vmatpush.bf16.msra.mxu2 %v1435_v31  ;;  %1715 = vmatpush.bf16.msra.mxu3 %v1435_v31 }
 0x2a9   : > { %917 = vmatpush.bf16.msra.mxu0 %v1434_v32  ;;  %1716 = vmatpush.bf16.msra.mxu1 %v1434_v32 }
 0x2aa   : > { %1717 = vmatpush.bf16.msra.mxu2 %v1434_v32  ;;  %1718 = vmatpush.bf16.msra.mxu3 %v1434_v32 }
 0x2ad   : > { %918 = vmatpush.bf16.msra.mxu0 %v1433_v45  ;;  %1719 = vmatpush.bf16.msra.mxu1 %v1433_v45 }
 0x2ae   : > { %1720 = vmatpush.bf16.msra.mxu2 %v1433_v45  ;;  %1721 = vmatpush.bf16.msra.mxu3 %v1433_v45 }
 0x2b1   : > { %919 = vmatpush.bf16.msra.mxu0 %v1432_v46  ;;  %1722 = vmatpush.bf16.msra.mxu1 %v1432_v46 }
 0x2b2   : > { %1723 = vmatpush.bf16.msra.mxu2 %v1432_v46  ;;  %1724 = vmatpush.bf16.msra.mxu3 %v1432_v46 }
 0x2b4   : > { %920 = vmatmul.bf16.vlgmr.msra.gmra.mxu0 %v1424_v47  ;;  %930 = vmatmul.bf16.vlgmr.msra.gmra.mxu1 %v1426_v48 }
 0x2b5   : > { %940 = vmatmul.bf16.vlgmr.msra.gmra.mxu2 %v1428_v59  ;;  %950 = vmatmul.bf16.vlgmr.msra.gmra.mxu3 %v1430_v60 }
 0x2c4   : > { %925 = vmatmul.bf16.gmra.mxu0 %v1425_v61  ;;  %935 = vmatmul.bf16.gmra.mxu1 %v1427_v62 }
 0x2c5   : > { %945 = vmatmul.bf16.gmra.mxu2 %v1429_v63  ;;  %955 = vmatmul.bf16.gmra.mxu3 %v1431_v0 }
 0x331   : > { %v921_v2 = vpop.f32.mrf.mxu0  ;;  %v931_v3 = vpop.f32.mrf.mxu1 }
 0x332   : > { %v922_v4 = vadd.f32 %v2261_v1, %v921_v2  ;;  %v932_v5 = vadd.f32 %v2261_v1, %v931_v3 }
 0x334   : > { %vm961_vm0 = vcmp.ge.f32.partialorder %v922_v4, 0.0  ;;  %v977_v6 = vmul.f32 0.25, %v922_v4  ;;  %vm965_vm1 = vcmp.ge.f32.partialorder %v932_v5, 0.0  ;;  %v981_v7 = vmul.f32 0.25, %v932_v5 }
 0x336   : > { %v2265_v9 = vsel %vm961_vm0, %v922_v4, %v977_v6  ;;  %v2267_v8 = vsel %vm965_vm1, %v932_v5, %v981_v7 }
 0x338   : > { %v941_v10 = vpop.f32.mrf.mxu2  ;;  %v951_v11 = vpop.f32.mrf.mxu3 }
 0x339   : > { %v942_v12 = vadd.f32 %v2261_v1, %v941_v10  ;;  %v952_v13 = vadd.f32 %v2261_v1, %v951_v11  ;;  %v923_v14 = vpop.f32.mrf.mxu0  ;;  %v933_v17 = vpop.f32.mrf.mxu1 }
 0x33a   : > { %v924_v18 = vadd.f32 %v2261_v1, %v923_v14  ;;  %v934_v19 = vadd.f32 %v2261_v1, %v933_v17 }
 0x33b   : > { %vm969_vm2 = vcmp.ge.f32.partialorder %v942_v12, 0.0  ;;  %v985_v20 = vmul.f32 0.25, %v942_v12  ;;  %vm973_vm3 = vcmp.ge.f32.partialorder %v952_v13, 0.0  ;;  %v989_v21 = vmul.f32 0.25, %v952_v13 }
 0x33c   : > { %vm962_vm4 = vcmp.ge.f32.partialorder %v924_v18, 0.0  ;;  %v978_v22 = vmul.f32 0.25, %v924_v18  ;;  %vm966_vm5 = vcmp.ge.f32.partialorder %v934_v19, 0.0  ;;  %v982_v23 = vmul.f32 0.25, %v934_v19 }
 0x33d   : > { %v2273_v24 = vsel %vm969_vm2, %v942_v12, %v985_v20  ;;  %v2275_v25 = vsel %vm973_vm3, %v952_v13, %v989_v21 }
 0x33e   : > { %v2277_v26 = vsel %vm962_vm4, %v924_v18, %v978_v22  ;;  %v2279_v27 = vsel %vm966_vm5, %v934_v19, %v982_v23 }
 0x340   : > { %v943_v28 = vpop.f32.mrf.mxu2  ;;  %v953_v33 = vpop.f32.mrf.mxu3 }
 0x341   : > { %v944_v34 = vadd.f32 %v2261_v1, %v943_v28  ;;  %v954_v35 = vadd.f32 %v2261_v1, %v953_v33  ;;  %v926_v36 = vpop.f32.mrf.mxu0  ;;  %v936_v37 = vpop.f32.mrf.mxu1 }
 0x342   : > { %v927_v38 = vadd.f32 %v2261_v1, %v926_v36  ;;  %v937_v39 = vadd.f32 %v2261_v1, %v936_v37 }
 0x343   : > { %vm970_vm6 = vcmp.ge.f32.partialorder %v944_v34, 0.0  ;;  %v986_v40 = vmul.f32 0.25, %v944_v34  ;;  %vm974_vm7 = vcmp.ge.f32.partialorder %v954_v35, 0.0  ;;  %v990_v41 = vmul.f32 0.25, %v954_v35 }
 0x344   : > { %vm963_vm8 = vcmp.ge.f32.partialorder %v927_v38, 0.0  ;;  %v979_v42 = vmul.f32 0.25, %v927_v38  ;;  %vm967_vm9 = vcmp.ge.f32.partialorder %v937_v39, 0.0  ;;  %v983_v43 = vmul.f32 0.25, %v937_v39 }
 0x345   : > { %v2285_v44 = vsel %vm970_vm6, %v944_v34, %v986_v40  ;;  %v2287_v49 = vsel %vm974_vm7, %v954_v35, %v990_v41 }
 0x346   : > { %v2289_v50 = vsel %vm963_vm8, %v927_v38, %v979_v42  ;;  %v2291_v51 = vsel %vm967_vm9, %v937_v39, %v983_v43 }
 0x348   : > { %v946_v52 = vpop.f32.mrf.mxu2  ;;  %v956_v53 = vpop.f32.mrf.mxu3 }
 0x349   : > { %v947_v54 = vadd.f32 %v2261_v1, %v946_v52  ;;  %v957_v55 = vadd.f32 %v2261_v1, %v956_v53  ;;  %v928_v56 = vpop.f32.mrf.mxu0  ;;  %v938_v57 = vpop.f32.mrf.mxu1 }
 0x34a   : > { %v929_v58 = vadd.f32 %v2261_v1, %v928_v56  ;;  %v939_v15 = vadd.f32 %v2261_v1, %v938_v57 }
 0x34b   : > { %vm971_vm10 = vcmp.ge.f32.partialorder %v947_v54, 0.0  ;;  %v987_v16 = vmul.f32 0.25, %v947_v54  ;;  %vm975_vm11 = vcmp.ge.f32.partialorder %v957_v55, 0.0  ;;  %v991_v29 = vmul.f32 0.25, %v957_v55 }
 0x34c   : > { %vm964_vm12 = vcmp.ge.f32.partialorder %v929_v58, 0.0  ;;  %v980_v30 = vmul.f32 0.25, %v929_v58  ;;  %vm968_vm13 = vcmp.ge.f32.partialorder %v939_v15, 0.0  ;;  %v984_v31 = vmul.f32 0.25, %v939_v15 }
 0x34d   : > { %v2297_v32 = vsel %vm971_vm10, %v947_v54, %v987_v16  ;;  %v2299_v45 = vsel %vm975_vm11, %v957_v55, %v991_v29 }
 0x34e   : > { %v2301_v46 = vsel %vm964_vm12, %v929_v58, %v980_v30  ;;  %v2303_v47 = vsel %vm968_vm13, %v939_v15, %v984_v31 }
 0x350   : > { %v948_v48 = vpop.f32.mrf.mxu2  ;;  %v958_v59 = vpop.f32.mrf.mxu3 }
 0x351   : > { %v949_v60 = vadd.f32 %v2261_v1, %v948_v48  ;;  %v959_v61 = vadd.f32 %v2261_v1, %v958_v59  ;;  %1012 = sbr.rel (%p1399_p0) target bundleno = 1048 (0x418), region = 76 }
 0x353   : > { %vm972_vm14 = vcmp.ge.f32.partialorder %v949_v60, 0.0  ;;  %v988_v62 = vmul.f32 0.25, %v949_v60  ;;  %vm976_vm15 = vcmp.ge.f32.partialorder %v959_v61, 0.0  ;;  %v992_v63 = vmul.f32 0.25, %v959_v61 }
 0x355   : > { %v2307_v0 = vsel %vm972_vm14, %v949_v60, %v988_v62  ;;  %v2309_v2 = vsel %vm976_vm15, %v959_v61, %v992_v63 }
 0x356   : > { %v1030_v1 = vld [vmem:[%s2313_s28 + $0x78] sm:$0xff]  ;;  %v1029_v3 = vld [vmem:[%s2313_s28 + $0x70] sm:$0xff]  ;;  %v1028_v4 = vld [vmem:[%s2313_s28 + $0x68] sm:$0xff] }
 0x357   : > { %1031 = vmatpush.msra.mxu0 %v1030_v1  ;;  %1725 = vmatpush.msra.mxu1 %v1030_v1  ;;  %v1027_v5 = vld [vmem:[%s2313_s28 + $0x60] sm:$0xff]  ;;  %v1026_v6 = vld [vmem:[%s2313_s28 + $0x58] sm:$0xff]  ;;  %v1025_v7 = vld [vmem:[%s2313_s28 + $0x50] sm:$0xff] }
 0x358   : > { %1726 = vmatpush.msra.mxu2 %v1030_v1  ;;  %1727 = vmatpush.msra.mxu3 %v1030_v1  ;;  %v1024_v10 = vld [vmem:[%s2313_s28 + $0x48] sm:$0xff]  ;;  %v1023_v11 = vld [vmem:[%s2313_s28 + $0x40] sm:$0xff]  ;;  %v1022_v12 = vld [vmem:[%s2313_s28 + $0x38] sm:$0xff] }
 0x359   : > { %1032 = vmatpush.msra.mxu0 %v1029_v3  ;;  %1728 = vmatpush.msra.mxu1 %v1029_v3  ;;  %v1021_v13 = vld [vmem:[%s2313_s28 + $0x30] sm:$0xff]  ;;  %v1020_v14 = vld [vmem:[%s2313_s28 + $0x28] sm:$0xff]  ;;  %v1019_v17 = vld [vmem:[%s2313_s28 + $0x20] sm:$0xff] }
 0x35a   : > { %1729 = vmatpush.msra.mxu2 %v1029_v3  ;;  %1730 = vmatpush.msra.mxu3 %v1029_v3  ;;  %v1018_v18 = vld [vmem:[%s2313_s28 + $0x18] sm:$0xff]  ;;  %v1017_v19 = vld [vmem:[%s2313_s28 + $0x10] sm:$0xff]  ;;  %v1016_v20 = vld [vmem:[%s2313_s28 + $0x8] sm:$0xff] }
 0x35b   : > { %1033 = vmatpush.msra.mxu0 %v1028_v4  ;;  %1731 = vmatpush.msra.mxu1 %v1028_v4  ;;  %v1015_v21 = vld [vmem:[%s2313_s28] sm:$0xff] }
 0x35c   : > { %1732 = vmatpush.msra.mxu2 %v1028_v4  ;;  %1733 = vmatpush.msra.mxu3 %v1028_v4 }
 0x35d   : > { %1034 = vmatpush.msra.mxu0 %v1027_v5  ;;  %1734 = vmatpush.msra.mxu1 %v1027_v5 }
 0x35e   : > { %1735 = vmatpush.msra.mxu2 %v1027_v5  ;;  %1736 = vmatpush.msra.mxu3 %v1027_v5 }
 0x35f   : > { %1035 = vmatpush.msra.mxu0 %v1026_v6  ;;  %1737 = vmatpush.msra.mxu1 %v1026_v6 }
 0x360   : > { %1738 = vmatpush.msra.mxu2 %v1026_v6  ;;  %1739 = vmatpush.msra.mxu3 %v1026_v6 }
 0x361   : > { %1036 = vmatpush.msra.mxu0 %v1025_v7  ;;  %1740 = vmatpush.msra.mxu1 %v1025_v7 }
 0x362   : > { %1741 = vmatpush.msra.mxu2 %v1025_v7  ;;  %1742 = vmatpush.msra.mxu3 %v1025_v7 }
 0x363   : > { %1037 = vmatpush.msra.mxu0 %v1024_v10  ;;  %1743 = vmatpush.msra.mxu1 %v1024_v10 }
 0x364   : > { %1744 = vmatpush.msra.mxu2 %v1024_v10  ;;  %1745 = vmatpush.msra.mxu3 %v1024_v10 }
 0x365   : > { %1038 = vmatpush.msra.mxu0 %v1023_v11  ;;  %1746 = vmatpush.msra.mxu1 %v1023_v11 }
 0x366   : > { %1747 = vmatpush.msra.mxu2 %v1023_v11  ;;  %1748 = vmatpush.msra.mxu3 %v1023_v11 }
 0x367   : > { %1039 = vmatpush.msra.mxu0 %v1022_v12  ;;  %1749 = vmatpush.msra.mxu1 %v1022_v12 }
 0x368   : > { %1750 = vmatpush.msra.mxu2 %v1022_v12  ;;  %1751 = vmatpush.msra.mxu3 %v1022_v12 }
 0x369   : > { %1040 = vmatpush.msra.mxu0 %v1021_v13  ;;  %1752 = vmatpush.msra.mxu1 %v1021_v13 }
 0x36a   : > { %1753 = vmatpush.msra.mxu2 %v1021_v13  ;;  %1754 = vmatpush.msra.mxu3 %v1021_v13 }
 0x36b   : > { %1041 = vmatpush.msra.mxu0 %v1020_v14  ;;  %1755 = vmatpush.msra.mxu1 %v1020_v14 }
 0x36c   : > { %1756 = vmatpush.msra.mxu2 %v1020_v14  ;;  %1757 = vmatpush.msra.mxu3 %v1020_v14 }
 0x36d   : > { %1042 = vmatpush.msra.mxu0 %v1019_v17  ;;  %1758 = vmatpush.msra.mxu1 %v1019_v17 }
 0x36e   : > { %1759 = vmatpush.msra.mxu2 %v1019_v17  ;;  %1760 = vmatpush.msra.mxu3 %v1019_v17 }
 0x36f   : > { %1043 = vmatpush.msra.mxu0 %v1018_v18  ;;  %1761 = vmatpush.msra.mxu1 %v1018_v18 }
 0x370   : > { %1762 = vmatpush.msra.mxu2 %v1018_v18  ;;  %1763 = vmatpush.msra.mxu3 %v1018_v18 }
 0x371   : > { %1044 = vmatpush.msra.mxu0 %v1017_v19  ;;  %1764 = vmatpush.msra.mxu1 %v1017_v19 }
 0x372   : > { %1765 = vmatpush.msra.mxu2 %v1017_v19  ;;  %1766 = vmatpush.msra.mxu3 %v1017_v19 }
 0x373   : > { %1045 = vmatpush.msra.mxu0 %v1016_v20  ;;  %1767 = vmatpush.msra.mxu1 %v1016_v20 }
 0x374   : > { %1768 = vmatpush.msra.mxu2 %v1016_v20  ;;  %1769 = vmatpush.msra.mxu3 %v1016_v20 }
 0x375   : > { %1046 = vmatpush.msra.mxu0 %v1015_v21  ;;  %1770 = vmatpush.msra.mxu1 %v1015_v21 }
 0x376   : > { %1771 = vmatpush.msra.mxu2 %v1015_v21  ;;  %1772 = vmatpush.msra.mxu3 %v1015_v21 }
 0x377   : > { %1047 = vmatmul.f32.vlgmr.msra.gmra.mxu0 %v2265_v9  ;;  %1059 = vmatmul.f32.vlgmr.msra.gmra.mxu1 %v2267_v8 }
 0x378   : > { %1071 = vmatmul.f32.vlgmr.msra.gmra.mxu2 %v2273_v24  ;;  %1083 = vmatmul.f32.vlgmr.msra.gmra.mxu3 %v2275_v25 }
 0x37f   : > { %1050 = vmatmul.f32.gmra.mxu0 %v2277_v26  ;;  %1062 = vmatmul.f32.gmra.mxu1 %v2279_v27 }
 0x380   : > { %1074 = vmatmul.f32.gmra.mxu2 %v2285_v44  ;;  %1086 = vmatmul.f32.gmra.mxu3 %v2287_v49 }
 0x387   : > { %1053 = vmatmul.f32.gmra.mxu0 %v2289_v50  ;;  %1065 = vmatmul.f32.gmra.mxu1 %v2291_v51 }
 0x388   : > { %1077 = vmatmul.f32.gmra.mxu2 %v2297_v32  ;;  %1089 = vmatmul.f32.gmra.mxu3 %v2299_v45 }
 0x38f   : > { %1056 = vmatmul.f32.gmra.mxu0 %v2301_v46  ;;  %1068 = vmatmul.f32.gmra.mxu1 %v2303_v47 }
 0x390   : > { %1080 = vmatmul.f32.gmra.mxu2 %v2307_v0  ;;  %1092 = vmatmul.f32.gmra.mxu3 %v2309_v2 }
 0x3f4   : > { %v1048_v22 = vpop.f32.mrf.mxu0  ;;  %v1060_v23 = vpop.f32.mrf.mxu1 }
 0x3fb   : > { %v1072_v28 = vpop.f32.mrf.mxu2  ;;  %v1084_v33 = vpop.f32.mrf.mxu3 }
 0x3fc   : > { %v1051_v34 = vpop.f32.mrf.mxu0  ;;  %v1063_v35 = vpop.f32.mrf.mxu1 }
 0x3fd   : > { %v1523_v36 = vpack.c.bf16 %v1051_v34, %v1048_v22  ;;  %v1533_v37 = vpack.c.bf16 %v1063_v35, %v1060_v23 }
 0x3ff   : > { %1524 = vst [vmem:[#allocation3 + $0x30] sm:$0xff] %v1523_v36  }
 0x400   : > { %1575 = vst [vmem:[#allocation3 + $0x18] sm:$0xff] %v1533_v37  }
 0x403   : > { %v1075_v38 = vpop.f32.mrf.mxu2  ;;  %v1087_v39 = vpop.f32.mrf.mxu3 }
 0x404   : > { %v1543_v40 = vpack.c.bf16 %v1075_v38, %v1072_v28  ;;  %v1553_v41 = vpack.c.bf16 %v1087_v39, %v1084_v33  ;;  %v1054_v42 = vpop.f32.mrf.mxu0  ;;  %v1066_v43 = vpop.f32.mrf.mxu1 }
 0x406   : > { %1577 = vst [vmem:[#allocation3 + $0x8] sm:$0xff] %v1543_v40  }
 0x407   : > { %1579 = vst [vmem:[#allocation3 + $0x28] sm:$0xff] %v1553_v41  }
 0x40b   : > { %v1078_v52 = vpop.f32.mrf.mxu2  ;;  %v1090_v53 = vpop.f32.mrf.mxu3 }
 0x40c   : > { %v1057_v54 = vpop.f32.mrf.mxu0  ;;  %v1069_v55 = vpop.f32.mrf.mxu1 }
 0x40d   : > { %v1528_v56 = vpack.c.bf16 %v1057_v54, %v1054_v42  ;;  %v1538_v57 = vpack.c.bf16 %v1069_v55, %v1066_v43 }
 0x40f   : > { %1574 = vst [vmem:[#allocation3] sm:$0xff] %v1528_v56  }
 0x410   : > { %1576 = vst [vmem:[#allocation3 + $0x10] sm:$0xff] %v1538_v57  }
 0x413   : > { %v1081_v58 = vpop.f32.mrf.mxu2  ;;  %v1093_v15 = vpop.f32.mrf.mxu3 }
 0x414   : > { %v1548_v16 = vpack.c.bf16 %v1081_v58, %v1078_v52  ;;  %v1558_v29 = vpack.c.bf16 %v1093_v15, %v1090_v53 }
 0x416   : > { %1578 = vst [vmem:[#allocation3 + $0x20] sm:$0xff] %v1548_v16  }
 0x417   : > { %1580 = vst [vmem:[#allocation3 + $0x38] sm:$0xff] %v1558_v29  }
 0x418 PF: > { %p1401_p1 = scmp.ne.s32.totalorder %s2014_s18, 2 }
 0x41a   : > { %1133 = sbr.rel (%p1401_p1) target bundleno = 1071 (0x42f), region = 80 }
 0x41f   : > { %1135 = vst [vmem:[#allocation12] sm:$0xff] %v2265_v9 }
 0x420   : > { %1136 = vst [vmem:[#allocation12 + $0x8] sm:$0xff] %v2277_v26 }
 0x421   : > { %1137 = vst [vmem:[#allocation12 + $0x10] sm:$0xff] %v2289_v50 }
 0x422   : > { %1138 = vst [vmem:[#allocation12 + $0x18] sm:$0xff] %v2301_v46 }
 0x423   : > { %1139 = vst [vmem:[#allocation12 + $0x20] sm:$0xff] %v2267_v8 }
 0x424   : > { %1140 = vst [vmem:[#allocation12 + $0x28] sm:$0xff] %v2279_v27 }
 0x425   : > { %1141 = vst [vmem:[#allocation12 + $0x30] sm:$0xff] %v2291_v51 }
 0x426   : > { %1142 = vst [vmem:[#allocation12 + $0x38] sm:$0xff] %v2303_v47 }
 0x427   : > { %1143 = vst [vmem:[#allocation12 + $0x40] sm:$0xff] %v2273_v24 }
 0x428   : > { %1144 = vst [vmem:[#allocation12 + $0x48] sm:$0xff] %v2285_v44 }
 0x429   : > { %1145 = vst [vmem:[#allocation12 + $0x50] sm:$0xff] %v2297_v32 }
 0x42a   : > { %1146 = vst [vmem:[#allocation12 + $0x58] sm:$0xff] %v2307_v0 }
 0x42b   : > { %1147 = vst [vmem:[#allocation12 + $0x60] sm:$0xff] %v2275_v25 }
 0x42c   : > { %1148 = vst [vmem:[#allocation12 + $0x68] sm:$0xff] %v2287_v49 }
 0x42d   : > { %1149 = vst [vmem:[#allocation12 + $0x70] sm:$0xff] %v2299_v45 }
 0x42e   : > { %1150 = vst [vmem:[#allocation12 + $0x78] sm:$0xff] %v2309_v2 }
 0x42f PF: > { %p1805_p2 = scmp.eq.s32.totalorder %s1253_s24, 2  ;;  %s1158_s25 = sshll.u32 %s2383_s5, 4  ;;  %s1159_s25 = int_to_ptr.hbm [resolvable:$true] %s1158_s25 }
 0x430   : > { %s2032_s6 = smov [#allocation12]   ;;  %s2033_s8 = smov 128  }
 0x431   : > { %s1156_s7 = sshll.u32 %s2032_s6, 4  ;;  %s2034_s9 = smov 8   ;;  %s1157_s7 = int_to_ptr.vmem [resolvable:$true] %s1156_s7 }
 0x432   : > { %1786 = dma.vmem_to_hbm [thread:$0]  (%p1805_p2), %s1157_s7, 2048, %s1159_s25, [#allocation8], %s2033_s8, %s2033_s8, %s2034_s9  }
 0x433   : > { %2009 = dma.done.wait (%p1805_p2), [#allocation8], 2048  }
 0x434   : > { %2011 = vsyncadd (%p1805_p2), [#allocation8], 4294965248 }
 0x435 PF: > { %s18_s20 = sadd.s32 1, %s2022_s20   ;;  %s2387_s18 = smov %s2018_s19 }
 0x436   : > { %p15_p3 = scmp.ge.s32.totalorder %s18_s20, 5   ;;  %s2388_s19 = smov %s2390_s30 }
 0x438   :  { %17 = sbr.rel (!%p15_p3) target bundleno = 4 (0x4), region = 115 }
 0x43d   :  { %1175 = vsyncpa [#allocation7], 1 }
 0x43e   :  { %1177 = vsyncpa [#allocation7 + $0x1], 1 }
 0x43f   :  { %1178 = vsyncpa [#allocation10], 1 }
 0x440   :  { %1179 = vsyncpa [#allocation8], 1 }
 0x441   :  { %1181 = vsyncpa [#allocation8 + $0x1], 1 }
 0x442   :  { %1182 = vsyncmov [#allocation5] }
 0x445   :  { %s1183_s24 = vpop.sfrf %1182 }
 0x446   :  { %p1406_p4 = scmp.ne.s32.totalorder %s1183_s24, 0 }
 0x448   :  { %1187 = shalt.err (%p1406_p4)  }

</bundles_post_ra>
